<compile_context>
chip_gen: v6e
topology: v6e:2x2x1
jax: 0.10.0
libtpu: 0.0.40
codegen_flags: <defaults>
</compile_context>

<pallas_src>
import numpy as np
import jax
import jax.numpy as jnp
from jax.experimental import pallas as pl
from jax.experimental.pallas import tpu as pltpu

B = 2            # batch
SEQ = 50         # token positions  -> Conv1d "channels"
EMB = 32         # embedding dim    -> Conv1d "width"
C1_OUT = 256
POOL_W = 11      # floor((32 + 2 - 3) / 3) + 1
C2_OUT = 50
C2_PAD = 128     # conv2 out-channels padded for lane-dense tiles
FLAT = C2_OUT * POOL_W   # 550
H1 = 256
NCLS = 10
NCLS_PAD = 128   # FC2 lanes padded for a lane-dense output store
VOCAB = 2000
MAX_NORM = 50.0
BN_EPS = 1e-5


def _recruitment_kernel(x_ref, w1_ref, b1_ref, uup_ref, udn_ref, sel_ref,
                        w2_ref, b2_ref, wl1_ref, bl1_ref, wl2_ref, bl2_ref,
                        o_ref):
    f32 = jnp.float32
    nb = o_ref.shape[0]
    pool_w = wl1_ref.shape[0]

    # ---- Conv1d(50 -> 256, k=3, pad=1) + ReLU: one im2col matmul ------------
    relu1 = jnp.maximum(
        jnp.dot(x_ref[...], w1_ref[...], preferred_element_type=f32)
        + b1_ref[...], 0.0)                                   # (B*32, 256)

    # ---- MaxPool1d(k=3, s=3, pad=1), entirely in registers ------------------
    # r_up[r] = relu1[r-1] (0 at batch fronts), r_dn[r] = relu1[r+1] (0 at
    # batch ends); relu1 >= 0 so a 0 row is equivalent to -inf pool padding.
    r_up = jnp.dot(uup_ref[...], relu1, preferred_element_type=f32)
    r_dn = jnp.dot(udn_ref[...], relu1, preferred_element_type=f32)
    dmax = jnp.maximum(jnp.maximum(relu1, r_up), r_dn)        # (B*32, 256)

    # ---- Conv1d(256 -> 50(pad 128), k=3, pad=1) + ReLU ----------------------
    # sel_ref[k] gathers the zero-padded pooled row (w+k-1) for every output
    # row (w, b), so each tap is a dense MXU matmul (no scratch, no slices).
    acc2 = b2_ref[...]                                        # (1, 128)
    for k in range(3):
        tap = jnp.dot(sel_ref[k], dmax, preferred_element_type=f32)      # (B*11, 256)
        acc2 = acc2 + jnp.dot(tap, w2_ref[k], preferred_element_type=f32)
    y = jnp.maximum(acc2, 0.0)                                # (B*11, 128), rows (w, b)

    # ---- Flatten + Dropout(id) + BatchNorm(folded) + Linear(550 -> 256) -----
    # wl1_ref[w] already carries the BN scale and PyTorch's (c*11+w) flatten
    # permutation; 11 independent matmuls combined with a small add tree.
    parts = [jnp.dot(y[w * nb:(w + 1) * nb, :], wl1_ref[w],
                     preferred_element_type=f32) for w in range(pool_w)]
    while len(parts) > 1:
        nxt = [parts[i] + parts[i + 1] for i in range(0, len(parts) - 1, 2)]
        if len(parts) % 2:
            nxt.append(parts[-1])
        parts = nxt
    h1 = parts[0] + bl1_ref[...]                              # (B, 256)

    # ---- Dropout(id) + Linear(256 -> 10, lane-padded) + Softmax -------------
    logits = jnp.dot(h1, wl2_ref[...], preferred_element_type=f32) + bl2_ref[...]
    m = jnp.max(logits, axis=-1, keepdims=True)
    e = jnp.exp(logits - m)                                   # padded lanes -> exactly 0
    s = jnp.sum(e, axis=-1, keepdims=True)
    o_ref[...] = e * pl.reciprocal(s, approx=True)


def pack_params(params, batch):
    """One-time repacking of the PyTorch-layout weights for the kernel."""
    scale = params["bn_gamma"] / jnp.sqrt(params["bn_var"] + BN_EPS)
    shift = params["bn_beta"] - params["bn_mean"] * scale

    w1 = jnp.transpose(params["conv1_w"], (2, 1, 0)).reshape(3 * SEQ, C1_OUT)
    b1 = params["conv1_b"][None, :]

    w2 = jnp.transpose(params["conv2_w"], (2, 1, 0))                    # (3, 256, 50)
    w2 = jnp.pad(w2, ((0, 0), (0, 0), (0, C2_PAD - C2_OUT)))            # (3, 256, 128)
    b2 = jnp.pad(params["conv2_b"], (0, C2_PAD - C2_OUT))[None, :]      # (1, 128)

    # Fold BN (inference affine) into FC1, and PyTorch's (c*11+w) flatten order
    # into the kernel's (w-major, channel-padded) layout.
    weff = scale[:, None] * params["fc1_w"].T                           # (550, 256)
    wl1 = weff.reshape(C2_OUT, POOL_W, H1).transpose(1, 0, 2)           # (11, 50, 256)
    wl1 = jnp.pad(wl1, ((0, 0), (0, C2_PAD - C2_OUT), (0, 0)))          # (11, 128, 256)
    bl1 = (params["fc1_b"] + shift @ params["fc1_w"].T)[None, :]        # (1, 256)

    wl2 = jnp.pad(params["fc2_w"].T, ((0, 0), (0, NCLS_PAD - NCLS)))    # (256, 128)
    bl2 = jnp.concatenate(
        [params["fc2_b"],
         jnp.full((NCLS_PAD - NCLS,), -1e30, jnp.float32)])[None, :]    # (1, 128)

    # Neighbour-shift matrices for the max-pool (batch-boundary masking built in).
    n = batch * EMB
    u_up = np.zeros((n, n), np.float32)
    u_dn = np.zeros((n, n), np.float32)
    for r in range(n):
        if r % EMB != 0:
            u_up[r, r - 1] = 1.0
        if r % EMB != EMB - 1:
            u_dn[r, r + 1] = 1.0
    # sel[k, w*batch+b, :] picks pooled row (w+k-1) of batch b (zero row when
    # that index falls in conv2's zero padding).
    sel = np.zeros((3, batch * POOL_W, n), np.float32)
    for k in range(3):
        for w in range(POOL_W):
            j = w + k - 1
            if 0 <= j < POOL_W:
                for b in range(batch):
                    sel[k, w * batch + b, b * EMB + 3 * j] = 1.0

    return {
        "embedding": params["embedding"],
        "w1": w1, "b1": b1, "w2": w2, "b2": b2,
        "u_up": jnp.asarray(u_up), "u_dn": jnp.asarray(u_dn),
        "sel": jnp.asarray(sel),
        "wl1": wl1, "bl1": bl1, "wl2": wl2, "bl2": bl2,
    }


@jax.jit
def recruitment_forward(tokens, packed):
    # Activation-side glue only: embedding gather + max_norm renorm + conv1 im2col.
    emb = jnp.take(packed["embedding"], tokens, axis=0)       # (B, 50, 32)
    norm = jnp.sqrt(jnp.sum(emb * emb, axis=-1, keepdims=True))
    emb = emb * jnp.minimum(1.0, MAX_NORM / jnp.maximum(norm, 1e-7))
    x = jnp.transpose(emb, (0, 2, 1))                         # (B, W=32, C=50)
    xp = jnp.pad(x, ((0, 0), (1, 1), (0, 0)))                 # (B, 34, 50)
    xcol = jnp.concatenate(
        [xp[:, 0:EMB], xp[:, 1:EMB + 1], xp[:, 2:EMB + 2]], axis=2)   # (B, 32, 150)
    nb = tokens.shape[0]
    nrows = nb * EMB
    xcol = xcol.reshape(nrows, 3 * SEQ)                       # (B*32, 150)

    cost = pl.CostEstimate(
        flops=2 * (nrows * 3 * SEQ * C1_OUT + 2 * nrows * nrows * C1_OUT
                   + 3 * nb * POOL_W * nrows * C1_OUT
                   + 3 * nb * POOL_W * C1_OUT * C2_PAD
                   + POOL_W * nb * C2_PAD * H1 + nb * H1 * NCLS_PAD),
        transcendentals=nb * NCLS_PAD,
        bytes_accessed=4 * (nrows * 3 * SEQ + 3 * SEQ * C1_OUT
                            + 2 * nrows * nrows + 3 * nb * POOL_W * nrows
                            + 3 * C1_OUT * C2_PAD + POOL_W * C2_PAD * H1
                            + H1 * NCLS_PAD + nb * NCLS_PAD))

    def full(*shape):
        return pl.BlockSpec(shape, lambda i, s=shape: (0,) * len(s))

    out = pl.pallas_call(
        _recruitment_kernel,
        out_shape=jax.ShapeDtypeStruct((nb, NCLS_PAD), jnp.float32),
        grid_spec=pltpu.PrefetchScalarGridSpec(
            num_scalar_prefetch=0,
            grid=(1,),
            in_specs=[
                full(nrows, 3 * SEQ),             # xcol (host im2col)
                full(3 * SEQ, C1_OUT),            # conv1 weight (150, 256)
                full(1, C1_OUT),                  # conv1 bias
                full(nrows, nrows),               # pool shift-up matrix
                full(nrows, nrows),               # pool shift-down matrix
                full(3, nb * POOL_W, nrows),      # conv2 tap row-selection matrices
                full(3, C1_OUT, C2_PAD),          # conv2 weight taps (padded)
                full(1, C2_PAD),                  # conv2 bias (padded)
                full(POOL_W, C2_PAD, H1),         # FC1 weight (BN folded, permuted)
                full(1, H1),                      # FC1 bias (BN folded)
                full(H1, NCLS_PAD),               # FC2 weight (lane padded)
                full(1, NCLS_PAD),                # FC2 bias (-1e30 in pad lanes)
            ],
            out_specs=full(nb, NCLS_PAD),
        ),
        compiler_params=pltpu.CompilerParams(dimension_semantics=("arbitrary",)),
        cost_estimate=cost,
    )(xcol, packed["w1"], packed["b1"], packed["u_up"], packed["u_dn"],
      packed["sel"], packed["w2"], packed["b2"], packed["wl1"], packed["bl1"],
      packed["wl2"], packed["bl2"])
    return out[:, :NCLS]


def init_params(key):
    ks = jax.random.split(key, 8)

    def uniform(k, shape, fan_in):
        bound = 1.0 / jnp.sqrt(float(fan_in))
        return jax.random.uniform(k, shape, jnp.float32, -bound, bound)

    return {
        "embedding": jax.random.normal(ks[0], (VOCAB, EMB), jnp.float32),
        "conv1_w": uniform(ks[1], (C1_OUT, SEQ, 3), SEQ * 3),
        "conv1_b": uniform(ks[2], (C1_OUT,), SEQ * 3),
        "conv2_w": uniform(ks[3], (C2_OUT, C1_OUT, 3), C1_OUT * 3),
        "conv2_b": uniform(ks[4], (C2_OUT,), C1_OUT * 3),
        "bn_gamma": jnp.ones((FLAT,), jnp.float32),
        "bn_beta": jnp.zeros((FLAT,), jnp.float32),
        "bn_mean": jnp.zeros((FLAT,), jnp.float32),
        "bn_var": jnp.ones((FLAT,), jnp.float32),
        "fc1_w": uniform(ks[5], (H1, FLAT), FLAT),
        "fc1_b": uniform(ks[6], (H1,), FLAT),
        "fc2_w": uniform(ks[7], (NCLS, H1), H1),
        "fc2_b": jnp.zeros((NCLS,), jnp.float32),
    }


def reference_forward(tokens, params):
    # Pure-JAX replica of the PyTorch forward (eval mode), NCW layout.
    emb = jnp.take(params["embedding"], tokens, axis=0)                 # (B, 50, 32)
    norm = jnp.linalg.norm(emb, axis=-1, keepdims=True)
    x = emb * jnp.minimum(1.0, MAX_NORM / jnp.maximum(norm, 1e-7))      # (B, C=50, W=32)

    def conv1d(v, w, b):
        y = jax.lax.conv_general_dilated(
            v, w, window_strides=(1,), padding=((1, 1),),
            dimension_numbers=("NCH", "OIH", "NCH"))
        return y + b[None, :, None]

    x = jax.nn.relu(conv1d(x, params["conv1_w"], params["conv1_b"]))    # (B, 256, 32)
    xp = jnp.pad(x, ((0, 0), (0, 0), (1, 1)), constant_values=-jnp.inf)
    xp = xp[:, :, :33].reshape(x.shape[0], x.shape[1], POOL_W, 3)
    x = jnp.max(xp, axis=-1)                                            # (B, 256, 11)
    x = jax.nn.relu(conv1d(x, params["conv2_w"], params["conv2_b"]))    # (B, 50, 11)
    x = x.reshape(x.shape[0], -1)                                       # (B, 550)
    x = ((x - params["bn_mean"]) / jnp.sqrt(params["bn_var"] + BN_EPS)
         * params["bn_gamma"] + params["bn_beta"])
    x = x @ params["fc1_w"].T + params["fc1_b"]
    x = x @ params["fc2_w"].T + params["fc2_b"]
    return jax.nn.softmax(x, axis=-1)


if __name__ == "__main__":
    key = jax.random.PRNGKey(0)
    pkey, tkey = jax.random.split(key)
    params = init_params(pkey)
    tokens = jax.random.randint(tkey, (B, SEQ), 0, VOCAB)               # (2, 50) int32 ids

    packed = pack_params(params, B)        # one-time weight repacking (hoisted)
    out = recruitment_forward(tokens, packed)
    out = jax.block_until_ready(out)

    ref = reference_forward(tokens, params)
    assert out.shape == (B, NCLS)
    assert bool(jnp.all(jnp.isfinite(out)))
    assert bool(jnp.allclose(jnp.sum(out, axis=-1), 1.0, atol=5e-3))
    assert bool(jnp.allclose(out, ref, atol=1e-2))
    # TODO(synk): training-mode Dropout / batch-statistics BatchNorm and the
    # in-place max_norm mutation of the Embedding weight are not reproduced
    # (forward implemented with inference semantics).
    print("KERNEL_OK")
</pallas_src>

<mosaic_0001>
module attributes {stable_mosaic.version = 11 : i64} {
  func.func @_recruitment_kernel(%arg0: i32, %arg1: memref<64x150xf32, #tpu.memory_space<vmem>>, %arg2: memref<150x256xf32, #tpu.memory_space<vmem>>, %arg3: memref<1x256xf32, #tpu.memory_space<vmem>>, %arg4: memref<64x64xf32, #tpu.memory_space<vmem>>, %arg5: memref<64x64xf32, #tpu.memory_space<vmem>>, %arg6: memref<3x22x64xf32, #tpu.memory_space<vmem>>, %arg7: memref<3x256x128xf32, #tpu.memory_space<vmem>>, %arg8: memref<1x128xf32, #tpu.memory_space<vmem>>, %arg9: memref<11x128x256xf32, #tpu.memory_space<vmem>>, %arg10: memref<1x256xf32, #tpu.memory_space<vmem>>, %arg11: memref<256x128xf32, #tpu.memory_space<vmem>>, %arg12: memref<1x128xf32, #tpu.memory_space<vmem>>, %arg13: memref<2x128xf32, #tpu.memory_space<vmem>>) attributes {dimension_semantics = [#tpu.dimension_semantics<arbitrary>], iteration_bounds = array<i64: 1>, scalar_prefetch = 0 : i64, scratch_operands = 0 : i64, tpu.core_type = #tpu.core_type<tc>, window_params = [{pipeline_mode = #tpu.pipeline_mode<synchronous>, transform_indices = @transform_0, window_bounds = array<i64: 64, 150>}, {pipeline_mode = #tpu.pipeline_mode<synchronous>, transform_indices = @transform_1, window_bounds = array<i64: 150, 256>}, {pipeline_mode = #tpu.pipeline_mode<synchronous>, transform_indices = @transform_2, window_bounds = array<i64: 1, 256>}, {pipeline_mode = #tpu.pipeline_mode<synchronous>, transform_indices = @transform_3, window_bounds = array<i64: 64, 64>}, {pipeline_mode = #tpu.pipeline_mode<synchronous>, transform_indices = @transform_4, window_bounds = array<i64: 64, 64>}, {pipeline_mode = #tpu.pipeline_mode<synchronous>, transform_indices = @transform_5, window_bounds = array<i64: 3, 22, 64>}, {pipeline_mode = #tpu.pipeline_mode<synchronous>, transform_indices = @transform_6, window_bounds = array<i64: 3, 256, 128>}, {pipeline_mode = #tpu.pipeline_mode<synchronous>, transform_indices = @transform_7, window_bounds = array<i64: 1, 128>}, {pipeline_mode = #tpu.pipeline_mode<synchronous>, transform_indices = @transform_8, window_bounds = array<i64: 11, 128, 256>}, {pipeline_mode = #tpu.pipeline_mode<synchronous>, transform_indices = @transform_9, window_bounds = array<i64: 1, 256>}, {pipeline_mode = #tpu.pipeline_mode<synchronous>, transform_indices = @transform_10, window_bounds = array<i64: 256, 128>}, {pipeline_mode = #tpu.pipeline_mode<synchronous>, transform_indices = @transform_11, window_bounds = array<i64: 1, 128>}, {pipeline_mode = #tpu.pipeline_mode<synchronous>, transform_indices = @transform_12, window_bounds = array<i64: 2, 128>}]} {
    %c0 = arith.constant 0 : index
    %c0_0 = arith.constant 0 : index
    %0 = vector.load %arg1[%c0, %c0_0] : memref<64x150xf32, #tpu.memory_space<vmem>>, vector<64x150xf32>
    %c0_1 = arith.constant 0 : index
    %c0_2 = arith.constant 0 : index
    %1 = vector.load %arg2[%c0_1, %c0_2] : memref<150x256xf32, #tpu.memory_space<vmem>>, vector<150x256xf32>
    %cst = arith.constant dense<0.000000e+00> : vector<64x256xf32>
    %2 = tpu.matmul %0, %1, %cst {dimension_numbers = #tpu.dot_dimension_numbers<[1], [0], [0], [1], [0, 0, 1, 1], [], []>} : vector<64x150xf32>, vector<150x256xf32>, vector<64x256xf32> -> vector<64x256xf32>
    %c0_3 = arith.constant 0 : index
    %c0_4 = arith.constant 0 : index
    %3 = vector.load %arg3[%c0_3, %c0_4] : memref<1x256xf32, #tpu.memory_space<vmem>>, vector<1x256xf32>
    %4 = vector.broadcast %3 : vector<1x256xf32> to vector<64x256xf32>
    %5 = arith.addf %2, %4 : vector<64x256xf32>
    %cst_5 = arith.constant 0.000000e+00 : f32
    %6 = vector.broadcast %cst_5 : f32 to vector<64x256xf32>
    %7 = arith.maximumf %5, %6 : vector<64x256xf32>
    %c0_6 = arith.constant 0 : index
    %c0_7 = arith.constant 0 : index
    %8 = vector.load %arg4[%c0_6, %c0_7] : memref<64x64xf32, #tpu.memory_space<vmem>>, vector<64x64xf32>
    %cst_8 = arith.constant dense<0.000000e+00> : vector<64x256xf32>
    %9 = tpu.matmul %8, %7, %cst_8 {dimension_numbers = #tpu.dot_dimension_numbers<[1], [0], [0], [1], [0, 0, 1, 1], [], []>} : vector<64x64xf32>, vector<64x256xf32>, vector<64x256xf32> -> vector<64x256xf32>
    %c0_9 = arith.constant 0 : index
    %c0_10 = arith.constant 0 : index
    %10 = vector.load %arg5[%c0_9, %c0_10] : memref<64x64xf32, #tpu.memory_space<vmem>>, vector<64x64xf32>
    %cst_11 = arith.constant dense<0.000000e+00> : vector<64x256xf32>
    %11 = tpu.matmul %10, %7, %cst_11 {dimension_numbers = #tpu.dot_dimension_numbers<[1], [0], [0], [1], [0, 0, 1, 1], [], []>} : vector<64x64xf32>, vector<64x256xf32>, vector<64x256xf32> -> vector<64x256xf32>
    %12 = arith.maximumf %7, %9 : vector<64x256xf32>
    %13 = arith.maximumf %12, %11 : vector<64x256xf32>
    %c0_12 = arith.constant 0 : index
    %c0_13 = arith.constant 0 : index
    %14 = vector.load %arg8[%c0_12, %c0_13] : memref<1x128xf32, #tpu.memory_space<vmem>>, vector<1x128xf32>
    %c0_14 = arith.constant 0 : index
    %c0_15 = arith.constant 0 : index
    %c0_16 = arith.constant 0 : index
    %15 = vector.load %arg6[%c0_14, %c0_15, %c0_16] : memref<3x22x64xf32, #tpu.memory_space<vmem>>, vector<1x22x64xf32>
    %16 = vector.shape_cast %15 : vector<1x22x64xf32> to vector<22x64xf32>
    %cst_17 = arith.constant dense<0.000000e+00> : vector<22x256xf32>
    %17 = tpu.matmul %16, %13, %cst_17 {dimension_numbers = #tpu.dot_dimension_numbers<[1], [0], [0], [1], [0, 0, 1, 1], [], []>} : vector<22x64xf32>, vector<64x256xf32>, vector<22x256xf32> -> vector<22x256xf32>
    %c0_18 = arith.constant 0 : index
    %c0_19 = arith.constant 0 : index
    %c0_20 = arith.constant 0 : index
    %18 = vector.load %arg7[%c0_18, %c0_19, %c0_20] : memref<3x256x128xf32, #tpu.memory_space<vmem>>, vector<1x256x128xf32>
    %19 = vector.shape_cast %18 : vector<1x256x128xf32> to vector<256x128xf32>
    %cst_21 = arith.constant dense<0.000000e+00> : vector<22x128xf32>
    %20 = tpu.matmul %17, %19, %cst_21 {dimension_numbers = #tpu.dot_dimension_numbers<[1], [0], [0], [1], [0, 0, 1, 1], [], []>} : vector<22x256xf32>, vector<256x128xf32>, vector<22x128xf32> -> vector<22x128xf32>
    %21 = vector.broadcast %14 : vector<1x128xf32> to vector<22x128xf32>
    %22 = arith.addf %21, %20 : vector<22x128xf32>
    %c1 = arith.constant 1 : index
    %c0_22 = arith.constant 0 : index
    %c0_23 = arith.constant 0 : index
    %23 = vector.load %arg6[%c1, %c0_22, %c0_23] : memref<3x22x64xf32, #tpu.memory_space<vmem>>, vector<1x22x64xf32>
    %24 = vector.shape_cast %23 : vector<1x22x64xf32> to vector<22x64xf32>
    %cst_24 = arith.constant dense<0.000000e+00> : vector<22x256xf32>
    %25 = tpu.matmul %24, %13, %cst_24 {dimension_numbers = #tpu.dot_dimension_numbers<[1], [0], [0], [1], [0, 0, 1, 1], [], []>} : vector<22x64xf32>, vector<64x256xf32>, vector<22x256xf32> -> vector<22x256xf32>
    %c1_25 = arith.constant 1 : index
    %c0_26 = arith.constant 0 : index
    %c0_27 = arith.constant 0 : index
    %26 = vector.load %arg7[%c1_25, %c0_26, %c0_27] : memref<3x256x128xf32, #tpu.memory_space<vmem>>, vector<1x256x128xf32>
    %27 = vector.shape_cast %26 : vector<1x256x128xf32> to vector<256x128xf32>
    %cst_28 = arith.constant dense<0.000000e+00> : vector<22x128xf32>
    %28 = tpu.matmul %25, %27, %cst_28 {dimension_numbers = #tpu.dot_dimension_numbers<[1], [0], [0], [1], [0, 0, 1, 1], [], []>} : vector<22x256xf32>, vector<256x128xf32>, vector<22x128xf32> -> vector<22x128xf32>
    %29 = arith.addf %22, %28 : vector<22x128xf32>
    %c2 = arith.constant 2 : index
    %c0_29 = arith.constant 0 : index
    %c0_30 = arith.constant 0 : index
    %30 = vector.load %arg6[%c2, %c0_29, %c0_30] : memref<3x22x64xf32, #tpu.memory_space<vmem>>, vector<1x22x64xf32>
    %31 = vector.shape_cast %30 : vector<1x22x64xf32> to vector<22x64xf32>
    %cst_31 = arith.constant dense<0.000000e+00> : vector<22x256xf32>
    %32 = tpu.matmul %31, %13, %cst_31 {dimension_numbers = #tpu.dot_dimension_numbers<[1], [0], [0], [1], [0, 0, 1, 1], [], []>} : vector<22x64xf32>, vector<64x256xf32>, vector<22x256xf32> -> vector<22x256xf32>
    %c2_32 = arith.constant 2 : index
    %c0_33 = arith.constant 0 : index
    %c0_34 = arith.constant 0 : index
    %33 = vector.load %arg7[%c2_32, %c0_33, %c0_34] : memref<3x256x128xf32, #tpu.memory_space<vmem>>, vector<1x256x128xf32>
    %34 = vector.shape_cast %33 : vector<1x256x128xf32> to vector<256x128xf32>
    %cst_35 = arith.constant dense<0.000000e+00> : vector<22x128xf32>
    %35 = tpu.matmul %32, %34, %cst_35 {dimension_numbers = #tpu.dot_dimension_numbers<[1], [0], [0], [1], [0, 0, 1, 1], [], []>} : vector<22x256xf32>, vector<256x128xf32>, vector<22x128xf32> -> vector<22x128xf32>
    %36 = arith.addf %29, %35 : vector<22x128xf32>
    %cst_36 = arith.constant 0.000000e+00 : f32
    %37 = vector.broadcast %cst_36 : f32 to vector<22x128xf32>
    %38 = arith.maximumf %36, %37 : vector<22x128xf32>
    %39 = vector.extract_strided_slice %38 {offsets = [0, 0], sizes = [2, 128], strides = [1, 1]} : vector<22x128xf32> to vector<2x128xf32>
    %c0_37 = arith.constant 0 : index
    %c0_38 = arith.constant 0 : index
    %c0_39 = arith.constant 0 : index
    %40 = vector.load %arg9[%c0_37, %c0_38, %c0_39] : memref<11x128x256xf32, #tpu.memory_space<vmem>>, vector<1x128x256xf32>
    %41 = vector.shape_cast %40 : vector<1x128x256xf32> to vector<128x256xf32>
    %cst_40 = arith.constant dense<0.000000e+00> : vector<2x256xf32>
    %42 = tpu.matmul %39, %41, %cst_40 {dimension_numbers = #tpu.dot_dimension_numbers<[1], [0], [0], [1], [0, 0, 1, 1], [], []>} : vector<2x128xf32>, vector<128x256xf32>, vector<2x256xf32> -> vector<2x256xf32>
    %43 = vector.extract_strided_slice %38 {offsets = [2, 0], sizes = [2, 128], strides = [1, 1]} : vector<22x128xf32> to vector<2x128xf32>
    %c1_41 = arith.constant 1 : index
    %c0_42 = arith.constant 0 : index
    %c0_43 = arith.constant 0 : index
    %44 = vector.load %arg9[%c1_41, %c0_42, %c0_43] : memref<11x128x256xf32, #tpu.memory_space<vmem>>, vector<1x128x256xf32>
    %45 = vector.shape_cast %44 : vector<1x128x256xf32> to vector<128x256xf32>
    %cst_44 = arith.constant dense<0.000000e+00> : vector<2x256xf32>
    %46 = tpu.matmul %43, %45, %cst_44 {dimension_numbers = #tpu.dot_dimension_numbers<[1], [0], [0], [1], [0, 0, 1, 1], [], []>} : vector<2x128xf32>, vector<128x256xf32>, vector<2x256xf32> -> vector<2x256xf32>
    %47 = vector.extract_strided_slice %38 {offsets = [4, 0], sizes = [2, 128], strides = [1, 1]} : vector<22x128xf32> to vector<2x128xf32>
    %c2_45 = arith.constant 2 : index
    %c0_46 = arith.constant 0 : index
    %c0_47 = arith.constant 0 : index
    %48 = vector.load %arg9[%c2_45, %c0_46, %c0_47] : memref<11x128x256xf32, #tpu.memory_space<vmem>>, vector<1x128x256xf32>
    %49 = vector.shape_cast %48 : vector<1x128x256xf32> to vector<128x256xf32>
    %cst_48 = arith.constant dense<0.000000e+00> : vector<2x256xf32>
    %50 = tpu.matmul %47, %49, %cst_48 {dimension_numbers = #tpu.dot_dimension_numbers<[1], [0], [0], [1], [0, 0, 1, 1], [], []>} : vector<2x128xf32>, vector<128x256xf32>, vector<2x256xf32> -> vector<2x256xf32>
    %51 = vector.extract_strided_slice %38 {offsets = [6, 0], sizes = [2, 128], strides = [1, 1]} : vector<22x128xf32> to vector<2x128xf32>
    %c3 = arith.constant 3 : index
    %c0_49 = arith.constant 0 : index
    %c0_50 = arith.constant 0 : index
    %52 = vector.load %arg9[%c3, %c0_49, %c0_50] : memref<11x128x256xf32, #tpu.memory_space<vmem>>, vector<1x128x256xf32>
    %53 = vector.shape_cast %52 : vector<1x128x256xf32> to vector<128x256xf32>
    %cst_51 = arith.constant dense<0.000000e+00> : vector<2x256xf32>
    %54 = tpu.matmul %51, %53, %cst_51 {dimension_numbers = #tpu.dot_dimension_numbers<[1], [0], [0], [1], [0, 0, 1, 1], [], []>} : vector<2x128xf32>, vector<128x256xf32>, vector<2x256xf32> -> vector<2x256xf32>
    %55 = vector.extract_strided_slice %38 {offsets = [8, 0], sizes = [2, 128], strides = [1, 1]} : vector<22x128xf32> to vector<2x128xf32>
    %c4 = arith.constant 4 : index
    %c0_52 = arith.constant 0 : index
    %c0_53 = arith.constant 0 : index
    %56 = vector.load %arg9[%c4, %c0_52, %c0_53] : memref<11x128x256xf32, #tpu.memory_space<vmem>>, vector<1x128x256xf32>
    %57 = vector.shape_cast %56 : vector<1x128x256xf32> to vector<128x256xf32>
    %cst_54 = arith.constant dense<0.000000e+00> : vector<2x256xf32>
    %58 = tpu.matmul %55, %57, %cst_54 {dimension_numbers = #tpu.dot_dimension_numbers<[1], [0], [0], [1], [0, 0, 1, 1], [], []>} : vector<2x128xf32>, vector<128x256xf32>, vector<2x256xf32> -> vector<2x256xf32>
    %59 = vector.extract_strided_slice %38 {offsets = [10, 0], sizes = [2, 128], strides = [1, 1]} : vector<22x128xf32> to vector<2x128xf32>
    %c5 = arith.constant 5 : index
    %c0_55 = arith.constant 0 : index
    %c0_56 = arith.constant 0 : index
    %60 = vector.load %arg9[%c5, %c0_55, %c0_56] : memref<11x128x256xf32, #tpu.memory_space<vmem>>, vector<1x128x256xf32>
    %61 = vector.shape_cast %60 : vector<1x128x256xf32> to vector<128x256xf32>
    %cst_57 = arith.constant dense<0.000000e+00> : vector<2x256xf32>
    %62 = tpu.matmul %59, %61, %cst_57 {dimension_numbers = #tpu.dot_dimension_numbers<[1], [0], [0], [1], [0, 0, 1, 1], [], []>} : vector<2x128xf32>, vector<128x256xf32>, vector<2x256xf32> -> vector<2x256xf32>
    %63 = vector.extract_strided_slice %38 {offsets = [12, 0], sizes = [2, 128], strides = [1, 1]} : vector<22x128xf32> to vector<2x128xf32>
    %c6 = arith.constant 6 : index
    %c0_58 = arith.constant 0 : index
    %c0_59 = arith.constant 0 : index
    %64 = vector.load %arg9[%c6, %c0_58, %c0_59] : memref<11x128x256xf32, #tpu.memory_space<vmem>>, vector<1x128x256xf32>
    %65 = vector.shape_cast %64 : vector<1x128x256xf32> to vector<128x256xf32>
    %cst_60 = arith.constant dense<0.000000e+00> : vector<2x256xf32>
    %66 = tpu.matmul %63, %65, %cst_60 {dimension_numbers = #tpu.dot_dimension_numbers<[1], [0], [0], [1], [0, 0, 1, 1], [], []>} : vector<2x128xf32>, vector<128x256xf32>, vector<2x256xf32> -> vector<2x256xf32>
    %67 = vector.extract_strided_slice %38 {offsets = [14, 0], sizes = [2, 128], strides = [1, 1]} : vector<22x128xf32> to vector<2x128xf32>
    %c7 = arith.constant 7 : index
    %c0_61 = arith.constant 0 : index
    %c0_62 = arith.constant 0 : index
    %68 = vector.load %arg9[%c7, %c0_61, %c0_62] : memref<11x128x256xf32, #tpu.memory_space<vmem>>, vector<1x128x256xf32>
    %69 = vector.shape_cast %68 : vector<1x128x256xf32> to vector<128x256xf32>
    %cst_63 = arith.constant dense<0.000000e+00> : vector<2x256xf32>
    %70 = tpu.matmul %67, %69, %cst_63 {dimension_numbers = #tpu.dot_dimension_numbers<[1], [0], [0], [1], [0, 0, 1, 1], [], []>} : vector<2x128xf32>, vector<128x256xf32>, vector<2x256xf32> -> vector<2x256xf32>
    %71 = vector.extract_strided_slice %38 {offsets = [16, 0], sizes = [2, 128], strides = [1, 1]} : vector<22x128xf32> to vector<2x128xf32>
    %c8 = arith.constant 8 : index
    %c0_64 = arith.constant 0 : index
    %c0_65 = arith.constant 0 : index
    %72 = vector.load %arg9[%c8, %c0_64, %c0_65] : memref<11x128x256xf32, #tpu.memory_space<vmem>>, vector<1x128x256xf32>
    %73 = vector.shape_cast %72 : vector<1x128x256xf32> to vector<128x256xf32>
    %cst_66 = arith.constant dense<0.000000e+00> : vector<2x256xf32>
    %74 = tpu.matmul %71, %73, %cst_66 {dimension_numbers = #tpu.dot_dimension_numbers<[1], [0], [0], [1], [0, 0, 1, 1], [], []>} : vector<2x128xf32>, vector<128x256xf32>, vector<2x256xf32> -> vector<2x256xf32>
    %75 = vector.extract_strided_slice %38 {offsets = [18, 0], sizes = [2, 128], strides = [1, 1]} : vector<22x128xf32> to vector<2x128xf32>
    %c9 = arith.constant 9 : index
    %c0_67 = arith.constant 0 : index
    %c0_68 = arith.constant 0 : index
    %76 = vector.load %arg9[%c9, %c0_67, %c0_68] : memref<11x128x256xf32, #tpu.memory_space<vmem>>, vector<1x128x256xf32>
    %77 = vector.shape_cast %76 : vector<1x128x256xf32> to vector<128x256xf32>
    %cst_69 = arith.constant dense<0.000000e+00> : vector<2x256xf32>
    %78 = tpu.matmul %75, %77, %cst_69 {dimension_numbers = #tpu.dot_dimension_numbers<[1], [0], [0], [1], [0, 0, 1, 1], [], []>} : vector<2x128xf32>, vector<128x256xf32>, vector<2x256xf32> -> vector<2x256xf32>
    %79 = vector.extract_strided_slice %38 {offsets = [20, 0], sizes = [2, 128], strides = [1, 1]} : vector<22x128xf32> to vector<2x128xf32>
    %c10 = arith.constant 10 : index
    %c0_70 = arith.constant 0 : index
    %c0_71 = arith.constant 0 : index
    %80 = vector.load %arg9[%c10, %c0_70, %c0_71] : memref<11x128x256xf32, #tpu.memory_space<vmem>>, vector<1x128x256xf32>
    %81 = vector.shape_cast %80 : vector<1x128x256xf32> to vector<128x256xf32>
    %cst_72 = arith.constant dense<0.000000e+00> : vector<2x256xf32>
    %82 = tpu.matmul %79, %81, %cst_72 {dimension_numbers = #tpu.dot_dimension_numbers<[1], [0], [0], [1], [0, 0, 1, 1], [], []>} : vector<2x128xf32>, vector<128x256xf32>, vector<2x256xf32> -> vector<2x256xf32>
    %83 = arith.addf %42, %46 : vector<2x256xf32>
    %84 = arith.addf %50, %54 : vector<2x256xf32>
    %85 = arith.addf %58, %62 : vector<2x256xf32>
    %86 = arith.addf %66, %70 : vector<2x256xf32>
    %87 = arith.addf %74, %78 : vector<2x256xf32>
    %88 = arith.addf %83, %84 : vector<2x256xf32>
    %89 = arith.addf %85, %86 : vector<2x256xf32>
    %90 = arith.addf %87, %82 : vector<2x256xf32>
    %91 = arith.addf %88, %89 : vector<2x256xf32>
    %92 = arith.addf %91, %90 : vector<2x256xf32>
    %c0_73 = arith.constant 0 : index
    %c0_74 = arith.constant 0 : index
    %93 = vector.load %arg10[%c0_73, %c0_74] : memref<1x256xf32, #tpu.memory_space<vmem>>, vector<1x256xf32>
    %94 = vector.broadcast %93 : vector<1x256xf32> to vector<2x256xf32>
    %95 = arith.addf %92, %94 : vector<2x256xf32>
    %c0_75 = arith.constant 0 : index
    %c0_76 = arith.constant 0 : index
    %96 = vector.load %arg11[%c0_75, %c0_76] : memref<256x128xf32, #tpu.memory_space<vmem>>, vector<256x128xf32>
    %cst_77 = arith.constant dense<0.000000e+00> : vector<2x128xf32>
    %97 = tpu.matmul %95, %96, %cst_77 {dimension_numbers = #tpu.dot_dimension_numbers<[1], [0], [0], [1], [0, 0, 1, 1], [], []>} : vector<2x256xf32>, vector<256x128xf32>, vector<2x128xf32> -> vector<2x128xf32>
    %c0_78 = arith.constant 0 : index
    %c0_79 = arith.constant 0 : index
    %98 = vector.load %arg12[%c0_78, %c0_79] : memref<1x128xf32, #tpu.memory_space<vmem>>, vector<1x128xf32>
    %99 = vector.broadcast %98 : vector<1x128xf32> to vector<2x128xf32>
    %100 = arith.addf %97, %99 : vector<2x128xf32>
    %cst_80 = arith.constant dense<0xFF800000> : vector<2xf32>
    %101 = vector.multi_reduction <maximumf>, %100, %cst_80 [1] : vector<2x128xf32> to vector<2xf32>
    %102 = vector.shape_cast %101 : vector<2xf32> to vector<2x1xf32>
    %103 = vector.broadcast %102 : vector<2x1xf32> to vector<2x128xf32>
    %104 = arith.subf %100, %103 : vector<2x128xf32>
    %105 = math.exp %104 : vector<2x128xf32>
    %cst_81 = arith.constant dense<0.000000e+00> : vector<2xf32>
    %106 = vector.multi_reduction <add>, %105, %cst_81 [1] : vector<2x128xf32> to vector<2xf32>
    %107 = vector.shape_cast %106 : vector<2xf32> to vector<2x1xf32>
    %108 = tpu.reciprocal %107 {approx = true} : vector<2x1xf32> -> vector<2x1xf32>
    %109 = vector.broadcast %108 : vector<2x1xf32> to vector<2x128xf32>
    %110 = arith.mulf %105, %109 : vector<2x128xf32>
    %c0_82 = arith.constant 0 : index
    %c0_83 = arith.constant 0 : index
    %111 = vector.load %arg13[%c0_82, %c0_83] : memref<2x128xf32, #tpu.memory_space<vmem>>, vector<2x128xf32>
    tpu.vector_store %arg13[%c0_82, %c0_83], %110 {strides = array<i32>} : memref<2x128xf32, #tpu.memory_space<vmem>>, vector<2x128xf32>,
    return
  }
  func.func @transform_0(%arg0: i32) -> (i32, i32) {
    %c0_i32 = arith.constant 0 : i32
    %c0_i32_0 = arith.constant 0 : i32
    %c0_i32_1 = arith.constant 0 : i32
    return %c0_i32, %c0_i32_0 : i32, i32
  }
  func.func @transform_1(%arg0: i32) -> (i32, i32) {
    %c0_i32 = arith.constant 0 : i32
    %c0_i32_0 = arith.constant 0 : i32
    %c0_i32_1 = arith.constant 0 : i32
    return %c0_i32, %c0_i32_0 : i32, i32
  }
  func.func @transform_2(%arg0: i32) -> (i32, i32) {
    %c0_i32 = arith.constant 0 : i32
    %c0_i32_0 = arith.constant 0 : i32
    %c0_i32_1 = arith.constant 0 : i32
    return %c0_i32, %c0_i32_0 : i32, i32
  }
  func.func @transform_3(%arg0: i32) -> (i32, i32) {
    %c0_i32 = arith.constant 0 : i32
    %c0_i32_0 = arith.constant 0 : i32
    %c0_i32_1 = arith.constant 0 : i32
    return %c0_i32, %c0_i32_0 : i32, i32
  }
  func.func @transform_4(%arg0: i32) -> (i32, i32) {
    %c0_i32 = arith.constant 0 : i32
    %c0_i32_0 = arith.constant 0 : i32
    %c0_i32_1 = arith.constant 0 : i32
    return %c0_i32, %c0_i32_0 : i32, i32
  }
  func.func @transform_5(%arg0: i32) -> (i32, i32, i32) {
    %c0_i32 = arith.constant 0 : i32
    %c0_i32_0 = arith.constant 0 : i32
    %c0_i32_1 = arith.constant 0 : i32
    %c0_i32_2 = arith.constant 0 : i32
    return %c0_i32, %c0_i32_0, %c0_i32_1 : i32, i32, i32
  }
  func.func @transform_6(%arg0: i32) -> (i32, i32, i32) {
    %c0_i32 = arith.constant 0 : i32
    %c0_i32_0 = arith.constant 0 : i32
    %c0_i32_1 = arith.constant 0 : i32
    %c0_i32_2 = arith.constant 0 : i32
    return %c0_i32, %c0_i32_0, %c0_i32_1 : i32, i32, i32
  }
  func.func @transform_7(%arg0: i32) -> (i32, i32) {
    %c0_i32 = arith.constant 0 : i32
    %c0_i32_0 = arith.constant 0 : i32
    %c0_i32_1 = arith.constant 0 : i32
    return %c0_i32, %c0_i32_0 : i32, i32
  }
  func.func @transform_8(%arg0: i32) -> (i32, i32, i32) {
    %c0_i32 = arith.constant 0 : i32
    %c0_i32_0 = arith.constant 0 : i32
    %c0_i32_1 = arith.constant 0 : i32
    %c0_i32_2 = arith.constant 0 : i32
    return %c0_i32, %c0_i32_0, %c0_i32_1 : i32, i32, i32
  }
  func.func @transform_9(%arg0: i32) -> (i32, i32) {
    %c0_i32 = arith.constant 0 : i32
    %c0_i32_0 = arith.constant 0 : i32
    %c0_i32_1 = arith.constant 0 : i32
    return %c0_i32, %c0_i32_0 : i32, i32
  }
  func.func @transform_10(%arg0: i32) -> (i32, i32) {
    %c0_i32 = arith.constant 0 : i32
    %c0_i32_0 = arith.constant 0 : i32
    %c0_i32_1 = arith.constant 0 : i32
    return %c0_i32, %c0_i32_0 : i32, i32
  }
  func.func @transform_11(%arg0: i32) -> (i32, i32) {
    %c0_i32 = arith.constant 0 : i32
    %c0_i32_0 = arith.constant 0 : i32
    %c0_i32_1 = arith.constant 0 : i32
    return %c0_i32, %c0_i32_0 : i32, i32
  }
  func.func @transform_12(%arg0: i32) -> (i32, i32) {
    %c0_i32 = arith.constant 0 : i32
    %c0_i32_0 = arith.constant 0 : i32
    %c0_i32_1 = arith.constant 0 : i32
    return %c0_i32, %c0_i32_0 : i32, i32
  }
}

</mosaic_0001>

<bundles_post_ra>
// kernel: recruitment_forward.1
= control target key start
LH: loop header
LB: loop body
LE: loop exit
PB: predicated region body
PF: predicated region fallthrough
CT: control target
= control target key end

     0   :  { %vm108_vm0 = vcmask 179200   ;;  %s5212_s0 = inlined_call_operand.vmem [shape: f32[64,150], index: 0, kind: input, shape index: {}]   ;;  %s5213_s1 = inlined_call_operand.vmem [shape: f32[150,256], index: 1, kind: input, shape index: {}]   ;;  %s5214_s2 = inlined_call_operand.vmem [shape: f32[1,256], index: 2, kind: input, shape index: {}]   ;;  %s5215_s3 = inlined_call_operand.vmem [shape: f32[64,64], index: 3, kind: input, shape index: {}]   ;;  %s5216_s4 = inlined_call_operand.vmem [shape: f32[64,64], index: 4, kind: input, shape index: {}]   ;;  %s5217_s5 = inlined_call_operand.vmem [shape: f32[3,22,64], index: 5, kind: input, shape index: {}]   ;;  %s5218_s6 = inlined_call_operand.vmem [shape: f32[3,256,128], index: 6, kind: input, shape index: {}]   ;;  %s5219_s7 = inlined_call_operand.vmem [shape: f32[1,128], index: 7, kind: input, shape index: {}]   ;;  %s5220_s8 = inlined_call_operand.vmem [shape: f32[11,128,256], index: 8, kind: input, shape index: {}]   ;;  %s5221_s9 = inlined_call_operand.vmem [shape: f32[1,256], index: 9, kind: input, shape index: {}]   ;;  %s5222_s10 = inlined_call_operand.vmem [shape: f32[256,128], index: 10, kind: input, shape index: {}]   ;;  %s5223_s11 = inlined_call_operand.vmem [shape: f32[1,128], index: 11, kind: input, shape index: {}]   ;;  %s5224_s12 = inlined_call_operand.hbm [shape: f32[2,128], index: 12, kind: output, shape index: {}]  }
   0x1   :  { %v89_v0 = vld [vmem:[%s5213_s1 + $0xf8] sm:$0xff]  ;;  %v88_v1 = vld [vmem:[%s5213_s1 + $0xf0] sm:$0xff]  ;;  %v87_v2 = vld [vmem:[%s5213_s1 + $0xe8] sm:$0xff] }
   0x2   :  { %140 = vmatprep.subr.mxu0 %v89_v0  ;;  %v86_v3 = vld [vmem:[%s5213_s1 + $0xe0] sm:$0xff]  ;;  %v85_v4 = vld [vmem:[%s5213_s1 + $0xd8] sm:$0xff]  ;;  %v84_v5 = vld [vmem:[%s5213_s1 + $0xd0] sm:$0xff] }
   0x3   :  { %141 = vmatpush1.msra.mxu0 %v88_v1  ;;  %v83_v6 = vld [vmem:[%s5213_s1 + $0xc8] sm:$0xff]  ;;  %v82_v7 = vld [vmem:[%s5213_s1 + $0xc0] sm:$0xff]  ;;  %v81_v8 = vld [vmem:[%s5213_s1 + $0xb8] sm:$0xff] }
   0x4   :  { %142 = vmatprep.subr.mxu0 %v87_v2  ;;  %v80_v9 = vld [vmem:[%s5213_s1 + $0xb0] sm:$0xff]  ;;  %v79_v10 = vld [vmem:[%s5213_s1 + $0xa8] sm:$0xff]  ;;  %v78_v11 = vld [vmem:[%s5213_s1 + $0xa0] sm:$0xff] }
   0x5   :  { %143 = vmatpush1.msra.mxu0 %v86_v3  ;;  %v77_v12 = vld [vmem:[%s5213_s1 + $0x98] sm:$0xff]  ;;  %v76_v13 = vld [vmem:[%s5213_s1 + $0x90] sm:$0xff]  ;;  %v75_v14 = vld [vmem:[%s5213_s1 + $0x88] sm:$0xff] }
   0x6   :  { %144 = vmatprep.subr.mxu0 %v85_v4  ;;  %v43_v15 = vld [vmem:[%s5212_s0 + $0x8] sm:$0xff]  ;;  %v74_v16 = vld [vmem:[%s5213_s1 + $0x80] sm:$0xff]  ;;  %v73_v17 = vld [vmem:[%s5213_s1 + $0x78] sm:$0xff] }
   0x7   :  { %145 = vmatpush1.msra.mxu0 %v84_v5  ;;  %2560 = vmatprep.mubr.msk.f32.mxu0 %vm108_vm0, %v43_v15  ;;  %v72_v18 = vld [vmem:[%s5213_s1 + $0x70] sm:$0xff]  ;;  %v71_v19 = vld [vmem:[%s5213_s1 + $0x68] sm:$0xff]  ;;  %v70_v20 = vld [vmem:[%s5213_s1 + $0x60] sm:$0xff] }
   0x8   :  { %146 = vmatprep.subr.mxu0 %v83_v6  ;;  %v69_v21 = vld [vmem:[%s5213_s1 + $0x58] sm:$0xff] }
   0x9   :  { %147 = vmatpush1.msra.mxu0 %v82_v7 }
   0xa   :  { %148 = vmatprep.subr.mxu0 %v81_v8 }
   0xb   :  { %149 = vmatpush1.msra.mxu0 %v80_v9 }
   0xc   :  { %150 = vmatprep.subr.mxu0 %v79_v10 }
   0xd   :  { %151 = vmatpush1.msra.mxu0 %v78_v11 }
   0xe   :  { %152 = vmatprep.subr.mxu0 %v77_v12 }
   0xf   :  { %153 = vmatpush1.msra.mxu0 %v76_v13 }
  0x10   :  { %154 = vmatprep.subr.mxu0 %v75_v14 }
  0x11   :  { %155 = vmatpush1.msra.mxu0 %v74_v16 }
  0x12   :  { %156 = vmatprep.subr.mxu0 %v73_v17 }
  0x13   :  { %157 = vmatpush1.msra.mxu0 %v72_v18 }
  0x14   :  { %17 = vsyncpa [#allocation3], 0  ;;  %158 = vmatprep.subr.mxu0 %v71_v19  ;;  %v68_v22 = vld [vmem:[%s5213_s1 + $0x50] sm:$0xff]  ;;  %v67_v23 = vld [vmem:[%s5213_s1 + $0x48] sm:$0xff]  ;;  %vm133_vm1 = vcmask 1045504   ;;  %v3171_v54 = vmov 0.0   ;;  %v98_v63 = vlaneseq }
  0x15   :  { %159 = vmatpush1.msra.mxu0 %v70_v20  ;;  %v66_v24 = vld [vmem:[%s5213_s1 + $0x40] sm:$0xff]  ;;  %v65_v25 = vld [vmem:[%s5213_s1 + $0x38] sm:$0xff]  ;;  %v64_v26 = vld [vmem:[%s5213_s1 + $0x30] sm:$0xff]  ;;  %366 = vmatprep.mubr.f32.mxu1 %v3171_v54  ;;  %vm277_vm2 = vcmask 523264   ;;  %vm2531_vm3 = vcmask 1041408   ;;  %s3172_s20 = smov [#allocation2]  }
  0x16   :  { %160 = vmatprep.subr.mxu0 %v69_v21  ;;  %v63_v27 = vld [vmem:[%s5213_s1 + $0x28] sm:$0xff]  ;;  %v62_v28 = vld [vmem:[%s5213_s1 + $0x20] sm:$0xff]  ;;  %v61_v29 = vld [vmem:[%s5213_s1 + $0x18] sm:$0xff]  ;;  %v3410_v2 = vshrl.u32 %v98_v63, 7  ;;  %s2550_s21 = sshll.u32 %s3172_s20, 4  ;;  %s2551_s21 = int_to_ptr.vmem [resolvable:$true] %s2550_s21 }
  0x17   :  { %161 = vmatpush1.msra.mxu0 %v68_v22  ;;  %v60_v30 = vld [vmem:[%s5213_s1 + $0x10] sm:$0xff]  ;;  %v59_v31 = vld [vmem:[%s5213_s1 + $0x8] sm:$0xff]  ;;  %v58_v32 = vld [vmem:[%s5213_s1] sm:$0xff]  ;;  %p3154_p1 = scmp.lt.s32.totalorder %s2551_s21, %s2551_s21 }
  0x18   :  { %162 = vmatprep.subr.mxu0 %v67_v23  ;;  %v95_v33 = vld [vmem:[%s5213_s1 + $0x128] sm:$0x3f]  ;;  %v94_v34 = vld [vmem:[%s5213_s1 + $0x120] sm:$0x3f]  ;;  %v93_v35 = vld [vmem:[%s5213_s1 + $0x118] sm:$0xff]  ;;  %v100_v5 = vsub.s32 0, %v3410_v2 }
  0x19   :  { %163 = vmatpush1.msra.mxu0 %v66_v24  ;;  %v92_v36 = vld [vmem:[%s5213_s1 + $0x110] sm:$0xff]  ;;  %v91_v37 = vld [vmem:[%s5213_s1 + $0x108] sm:$0xff]  ;;  %v90_v38 = vld [vmem:[%s5213_s1 + $0x100] sm:$0xff]  ;;  %v104_v8 = vsub.s32 1, %v3410_v2 }
  0x1a   :  { %164 = vmatprep.subr.mxu0 %v65_v25  ;;  %v42_v39 = vld [vmem:[%s5212_s0] sm:$0xff]  ;;  %v45_v40 = vld [vmem:[%s5212_s0 + $0x18] sm:$0xff]  ;;  %v44_v41 = vld [vmem:[%s5212_s0 + $0x10] sm:$0xff] }
  0x1b   :  { %165 = vmatpush1.msra.mxu0 %v64_v26  ;;  %v47_v42 = vld [vmem:[%s5212_s0 + $0x28] sm:$0xff]  ;;  %v46_v43 = vld [vmem:[%s5212_s0 + $0x20] sm:$0xff]  ;;  %v49_v44 = vld [vmem:[%s5212_s0 + $0x38] sm:$0xff] }
  0x1c   :  { %166 = vmatprep.subr.mxu0 %v63_v27  ;;  %v48_v45 = vld [vmem:[%s5212_s0 + $0x30] sm:$0xff]  ;;  %v51_v46 = vld [vmem:[%s5212_s0 + $0x48] sm:$0xff]  ;;  %v50_v47 = vld [vmem:[%s5212_s0 + $0x40] sm:$0xff] }
  0x1d   :  { %167 = vmatpush1.msra.mxu0 %v62_v28  ;;  %v53_v48 = vld [vmem:[%s5212_s0 + $0x58] sm:$0xff]  ;;  %v52_v49 = vld [vmem:[%s5212_s0 + $0x50] sm:$0xff]  ;;  %v55_v50 = vld [vmem:[%s5212_s0 + $0x68] sm:$0xff] }
  0x1e   :  { %168 = vmatprep.subr.mxu0 %v61_v29  ;;  %v54_v51 = vld [vmem:[%s5212_s0 + $0x60] sm:$0xff]  ;;  %v57_v52 = vld [vmem:[%s5212_s0 + $0x78] sm:$0xff]  ;;  %v56_v53 = vld [vmem:[%s5212_s0 + $0x70] sm:$0xff] }
  0x1f   :  { %169 = vmatpush1.msra.mxu0 %v60_v30  ;;  %v96_v7 = vld [vmem:[%s5214_s2] sm:$0x3]  ;;  %v719_v63 = vld [vmem:[%s5218_s6 + $0xf8] sm:$0xff] }
  0x20   :  { %170 = vmatprep.subr.mxu0 %v59_v31  ;;  %v101_v10 = vrot.slane %v96_v7, %v100_v5  ;;  %v105_v12 = vrot.slane %v96_v7, %v104_v8  ;;  %v716_v7 = vld [vmem:[%s5218_s6 + $0xe0] sm:$0xff] }
  0x21   :  { %171 = vmatpush1.msra.mxu0 %v58_v32 }
  0x22   :  { %2558 = vmatprep.subr.msk.mxu0 %vm133_vm1, %v95_v33 }
  0x23   :  { %2559 = vmatpush2.msk.msra.mxu0 %vm133_vm1, %v94_v34 }
  0x24   :  { %200 = vmatprep.subr.mxu0 %v93_v35 }
  0x25   :  { %201 = vmatpush2.msra.mxu0 %v92_v36 }
  0x26   :  { %202 = vmatprep.subr.mxu0 %v91_v37 }
  0x27   :  { %203 = vmatpush2.msra.mxu0 %v90_v38 }
  0x28   :  { %205 = vmatmul.mubr.f32.vlgmr.msra.gmra.mxu0 %v42_v39 }
  0x29   :  { %2561 = vmatprep.mubr.msk.f32.mxu0 %vm108_vm0, %v45_v40 }
  0x2c   :  { %211 = vmatmul.mubr.f32.gmra.mxu0 %v44_v41 }
  0x2d   :  { %2562 = vmatprep.mubr.msk.f32.mxu0 %vm108_vm0, %v47_v42 }
  0x30   :  { %217 = vmatmul.mubr.f32.gmra.mxu0 %v46_v43 }
  0x31   :  { %2563 = vmatprep.mubr.msk.f32.mxu0 %vm108_vm0, %v49_v44 }
  0x34   :  { %223 = vmatmul.mubr.f32.gmra.mxu0 %v48_v45 }
  0x35   :  { %2564 = vmatprep.mubr.msk.f32.mxu0 %vm108_vm0, %v51_v46  ;;  %v269_v46 = vld [vmem:[%s5215_s3] sm:$0xff] }
  0x38   :  { %229 = vmatmul.mubr.f32.gmra.mxu0 %v50_v47  ;;  %v270_v47 = vld [vmem:[%s5215_s3 + $0x8] sm:$0xff] }
  0x39   :  { %2565 = vmatprep.mubr.msk.f32.mxu0 %vm108_vm0, %v53_v48  ;;  %v271_v48 = vld [vmem:[%s5215_s3 + $0x10] sm:$0xff] }
  0x3c   :  { %235 = vmatmul.mubr.f32.gmra.mxu0 %v52_v49  ;;  %v272_v49 = vld [vmem:[%s5215_s3 + $0x18] sm:$0xff] }
  0x3d   :  { %2566 = vmatprep.mubr.msk.f32.mxu0 %vm108_vm0, %v55_v50  ;;  %v273_v50 = vld [vmem:[%s5215_s3 + $0x20] sm:$0xff] }
  0x40   :  { %241 = vmatmul.mubr.f32.gmra.mxu0 %v54_v51  ;;  %v274_v51 = vld [vmem:[%s5215_s3 + $0x28] sm:$0xff] }
  0x41   :  { %2567 = vmatprep.mubr.msk.f32.mxu0 %vm108_vm0, %v57_v52  ;;  %v275_v52 = vld [vmem:[%s5215_s3 + $0x30] sm:$0xff] }
  0x44   :  { %247 = vmatmul.mubr.f32.gmra.mxu0 %v56_v53  ;;  %v276_v53 = vld [vmem:[%s5215_s3 + $0x38] sm:$0xff] }
  0x45   :  { %669 = vmatprep.mubr.f32.mxu0 %v3171_v54 }
  0xe8   :  { %v206_v55 = vpop.f32.mrf.mxu0 }
  0xe9   :  { %v207_v40 = vadd.f32 %v206_v55, %v101_v10  ;;  %v415_v55 = vld [vmem:[%s5216_s4] sm:$0xff] }
  0xea   :  { %v208_v56 = vpop.f32.mrf.mxu0 }
  0xeb   :  { %v209_v38 = vadd.f32 %v208_v56, %v105_v12  ;;  %v3464_v45 = vmax.f32 %v207_v40, 0.0  ;;  %v416_v56 = vld [vmem:[%s5216_s4 + $0x8] sm:$0xff]  ;;  %v690_v40 = vld [vmem:[%s5218_s6 + $0x10] sm:$0xff] }
  0xec   :  { %v212_v57 = vpop.f32.mrf.mxu0 }
  0xed   :  { %v213_v36 = vadd.f32 %v212_v57, %v101_v10  ;;  %v3461_v44 = vmax.f32 %v209_v38, 0.0  ;;  %v417_v57 = vld [vmem:[%s5216_s4 + $0x10] sm:$0xff] }
  0xee   :  { %v214_v58 = vpop.f32.mrf.mxu0  ;;  %v706_v38 = vld [vmem:[%s5218_s6 + $0x90] sm:$0xff] }
  0xef   :  { %v215_v34 = vadd.f32 %v214_v58, %v105_v12  ;;  %v3458_v43 = vmax.f32 %v213_v36, 0.0  ;;  %v418_v58 = vld [vmem:[%s5216_s4 + $0x18] sm:$0xff] }
  0xf0   :  { %v218_v59 = vpop.f32.mrf.mxu0  ;;  %v691_v36 = vld [vmem:[%s5218_s6 + $0x18] sm:$0xff] }
  0xf1   :  { %v219_v32 = vadd.f32 %v218_v59, %v101_v10  ;;  %v3455_v42 = vmax.f32 %v215_v34, 0.0  ;;  %v419_v59 = vld [vmem:[%s5216_s4 + $0x20] sm:$0xff]  ;;  %v707_v34 = vld [vmem:[%s5218_s6 + $0x98] sm:$0xff] }
  0xf2   :  { %v220_v60 = vpop.f32.mrf.mxu0 }
  0xf3   :  { %v221_v30 = vadd.f32 %v220_v60, %v105_v12  ;;  %v3452_v41 = vmax.f32 %v219_v32, 0.0  ;;  %v420_v60 = vld [vmem:[%s5216_s4 + $0x28] sm:$0xff]  ;;  %v692_v32 = vld [vmem:[%s5218_s6 + $0x20] sm:$0xff] }
  0xf4   :  { %v224_v61 = vpop.f32.mrf.mxu0 }
  0xf5   :  { %v225_v28 = vadd.f32 %v224_v61, %v101_v10  ;;  %v3449_v39 = vmax.f32 %v221_v30, 0.0  ;;  %v421_v61 = vld [vmem:[%s5216_s4 + $0x30] sm:$0xff]  ;;  %v708_v30 = vld [vmem:[%s5218_s6 + $0xa0] sm:$0xff] }
  0xf6   :  { %v226_v62 = vpop.f32.mrf.mxu0 }
  0xf7   :  { %v227_v26 = vadd.f32 %v226_v62, %v105_v12  ;;  %v3446_v37 = vmax.f32 %v225_v28, 0.0  ;;  %v422_v62 = vld [vmem:[%s5216_s4 + $0x38] sm:$0xff]  ;;  %v693_v28 = vld [vmem:[%s5218_s6 + $0x28] sm:$0xff] }
  0xf8   :  { %v230_v0 = vpop.f32.mrf.mxu0 }
  0xf9   :  { %v231_v24 = vadd.f32 %v230_v0, %v101_v10  ;;  %v3443_v35 = vmax.f32 %v227_v26, 0.0  ;;  %v703_v0 = vld [vmem:[%s5218_s6 + $0x78] sm:$0xff]  ;;  %v709_v26 = vld [vmem:[%s5218_s6 + $0xa8] sm:$0xff] }
  0xfa   :  { %v232_v1 = vpop.f32.mrf.mxu0 }
  0xfb   :  { %v233_v22 = vadd.f32 %v232_v1, %v105_v12  ;;  %v3440_v33 = vmax.f32 %v231_v24, 0.0  ;;  %v718_v1 = vld [vmem:[%s5218_s6 + $0xf0] sm:$0xff] }
  0xfc   :  { %v236_v3 = vpop.f32.mrf.mxu0  ;;  %v694_v24 = vld [vmem:[%s5218_s6 + $0x30] sm:$0xff] }
  0xfd   :  { %v237_v20 = vadd.f32 %v236_v3, %v101_v10  ;;  %v3437_v31 = vmax.f32 %v233_v22, 0.0  ;;  %v702_v3 = vld [vmem:[%s5218_s6 + $0x70] sm:$0xff] }
  0xfe   :  { %v238_v4 = vpop.f32.mrf.mxu0  ;;  %v710_v22 = vld [vmem:[%s5218_s6 + $0xb0] sm:$0xff] }
  0xff   :  { %v239_v18 = vadd.f32 %v238_v4, %v105_v12  ;;  %v3434_v29 = vmax.f32 %v237_v20, 0.0  ;;  %v717_v4 = vld [vmem:[%s5218_s6 + $0xe8] sm:$0xff]  ;;  %v695_v20 = vld [vmem:[%s5218_s6 + $0x38] sm:$0xff] }
 0x100   :  { %v242_v6 = vpop.f32.mrf.mxu0 }
 0x101   :  { %v243_v17 = vadd.f32 %v242_v6, %v101_v10  ;;  %v3431_v27 = vmax.f32 %v239_v18, 0.0  ;;  %v701_v6 = vld [vmem:[%s5218_s6 + $0x68] sm:$0xff]  ;;  %v711_v18 = vld [vmem:[%s5218_s6 + $0xb8] sm:$0xff] }
 0x102   :  { %v244_v9 = vpop.f32.mrf.mxu0 }
 0x103   :  { %v245_v15 = vadd.f32 %v244_v9, %v105_v12  ;;  %v3428_v25 = vmax.f32 %v243_v17, 0.0  ;;  %v700_v9 = vld [vmem:[%s5218_s6 + $0x60] sm:$0xff] }
 0x104   :  { %v248_v11 = vpop.f32.mrf.mxu0  ;;  %v696_v17 = vld [vmem:[%s5218_s6 + $0x40] sm:$0xff] }
 0x105   :  { %v249_v13 = vadd.f32 %v248_v11, %v101_v10  ;;  %v3425_v23 = vmax.f32 %v245_v15, 0.0  ;;  %v715_v10 = vld [vmem:[%s5218_s6 + $0xd8] sm:$0xff]  ;;  %v697_v15 = vld [vmem:[%s5218_s6 + $0x48] sm:$0xff] }
 0x106   :  { %v250_v14 = vpop.f32.mrf.mxu0  ;;  %v699_v11 = vld [vmem:[%s5218_s6 + $0x58] sm:$0xff] }
 0x107   :  { %v251_v16 = vadd.f32 %v250_v14, %v105_v12  ;;  %v3423_v21 = vmax.f32 %v249_v13, 0.0  ;;  %v714_v12 = vld [vmem:[%s5218_s6 + $0xd0] sm:$0xff]  ;;  %v713_v14 = vld [vmem:[%s5218_s6 + $0xc8] sm:$0xff] }
 0x108   :  { %v698_v13 = vld [vmem:[%s5218_s6 + $0x50] sm:$0xff] }
 0x109   :  { %v3421_v19 = vmax.f32 %v251_v16, 0.0  ;;  %v712_v16 = vld [vmem:[%s5218_s6 + $0xc0] sm:$0xff] }
 0x10b   :  { %318 = vmatprep.subr.mxu1 %v3421_v19 }
 0x10c   :  { %319 = vmatpush1.msra.mxu1 %v3423_v21 }
 0x10d   :  { %320 = vmatprep.subr.mxu1 %v3425_v23 }
 0x10e   :  { %321 = vmatpush1.msra.mxu1 %v3428_v25 }
 0x10f   :  { %322 = vmatprep.subr.mxu1 %v3431_v27 }
 0x110   :  { %323 = vmatpush1.msra.mxu1 %v3434_v29 }
 0x111   :  { %324 = vmatprep.subr.mxu1 %v3437_v31 }
 0x112   :  { %325 = vmatpush1.msra.mxu1 %v3440_v33 }
 0x113   :  { %326 = vmatprep.subr.mxu1 %v3443_v35 }
 0x114   :  { %327 = vmatpush1.msra.mxu1 %v3446_v37 }
 0x115   :  { %328 = vmatprep.subr.mxu1 %v3449_v39 }
 0x116   :  { %329 = vmatpush1.msra.mxu1 %v3452_v41 }
 0x117   :  { %330 = vmatprep.subr.mxu1 %v3455_v42 }
 0x118   :  { %331 = vmatpush1.msra.mxu1 %v3458_v43 }
 0x119   :  { %332 = vmatprep.subr.mxu1 %v3461_v44 }
 0x11a   :  { %333 = vmatpush1.msra.mxu1 %v3464_v45 }
 0x11b   :  { %2568 = vmatmul.mubr.msk.f32.vlgmr.msra.gmra.mxu1 %vm277_vm2, %v269_v46  ;;  %463 = vmatprep.subr.mxu1 %v3421_v19  ;;  %v705_v46 = vld [vmem:[%s5218_s6 + $0x88] sm:$0xff] }
 0x11c   :  { %464 = vmatpush1.msra.mxu1 %v3423_v21  ;;  %372 = vmatprep.mubr.f32.mxu1 %v3171_v54 }
 0x11d   :  { %465 = vmatprep.subr.mxu1 %v3425_v23 }
 0x11e   :  { %466 = vmatpush1.msra.mxu1 %v3428_v25 }
 0x11f   :  { %2569 = vmatmul.mubr.msk.f32.gmra.mxu1 %vm277_vm2, %v270_v47  ;;  %467 = vmatprep.subr.mxu1 %v3431_v27  ;;  %v689_v47 = vld [vmem:[%s5218_s6 + $0x8] sm:$0xff] }
 0x120   :  { %468 = vmatpush1.msra.mxu1 %v3434_v29  ;;  %378 = vmatprep.mubr.f32.mxu1 %v3171_v54 }
 0x121   :  { %469 = vmatprep.subr.mxu1 %v3437_v31 }
 0x122   :  { %470 = vmatpush1.msra.mxu1 %v3440_v33 }
 0x123   :  { %2570 = vmatmul.mubr.msk.f32.gmra.mxu1 %vm277_vm2, %v271_v48  ;;  %471 = vmatprep.subr.mxu1 %v3443_v35  ;;  %v704_v48 = vld [vmem:[%s5218_s6 + $0x80] sm:$0xff] }
 0x124   :  { %472 = vmatpush1.msra.mxu1 %v3446_v37  ;;  %384 = vmatprep.mubr.f32.mxu1 %v3171_v54 }
 0x125   :  { %473 = vmatprep.subr.mxu1 %v3449_v39 }
 0x126   :  { %474 = vmatpush1.msra.mxu1 %v3452_v41 }
 0x127   :  { %2571 = vmatmul.mubr.msk.f32.gmra.mxu1 %vm277_vm2, %v272_v49  ;;  %475 = vmatprep.subr.mxu1 %v3455_v42  ;;  %v688_v49 = vld [vmem:[%s5218_s6] sm:$0xff] }
 0x128   :  { %476 = vmatpush1.msra.mxu1 %v3458_v43  ;;  %390 = vmatprep.mubr.f32.mxu1 %v3171_v54 }
 0x129   :  { %477 = vmatprep.subr.mxu1 %v3461_v44 }
 0x12a   :  { %478 = vmatpush1.msra.mxu1 %v3464_v45 }
 0x12b   :  { %2572 = vmatmul.mubr.msk.f32.gmra.mxu1 %vm277_vm2, %v273_v50  ;;  %2985 = vmatprep.subr.mxu1 %v719_v63 }
 0x12c   :  { %396 = vmatprep.mubr.f32.mxu1 %v3171_v54 }
 0x12f   :  { %2573 = vmatmul.mubr.msk.f32.gmra.mxu1 %vm277_vm2, %v274_v51 }
 0x130   :  { %402 = vmatprep.mubr.f32.mxu1 %v3171_v54 }
 0x133   :  { %2574 = vmatmul.mubr.msk.f32.gmra.mxu1 %vm277_vm2, %v275_v52 }
 0x134   :  { %408 = vmatprep.mubr.f32.mxu1 %v3171_v54 }
 0x137   :  { %2575 = vmatmul.mubr.msk.f32.gmra.mxu1 %vm277_vm2, %v276_v53 }
 0x138   :  { %511 = vmatprep.mubr.f32.mxu1 %v3171_v54 }
 0x13b   :  { %2576 = vmatmul.mubr.msk.f32.vlgmr.msra.gmra.mxu1 %vm277_vm2, %v415_v55 }
 0x13c   :  { %517 = vmatprep.mubr.f32.mxu1 %v3171_v54  ;;  %2986 = vmatpush3.msra.mxu1 %v703_v0 }
 0x13d   :  { %2987 = vmatprep.subr.mxu1 %v718_v1 }
 0x13e   :  { %2988 = vmatpush3.msra.mxu1 %v702_v3 }
 0x13f   :  { %2577 = vmatmul.mubr.msk.f32.gmra.mxu1 %vm277_vm2, %v416_v56  ;;  %2989 = vmatprep.subr.mxu1 %v717_v4 }
 0x140   :  { %523 = vmatprep.mubr.f32.mxu1 %v3171_v54  ;;  %2990 = vmatpush3.msra.mxu1 %v701_v6 }
 0x141   :  { %2991 = vmatprep.subr.mxu1 %v716_v7 }
 0x142   :  { %2992 = vmatpush3.msra.mxu1 %v700_v9 }
 0x143   :  { %2578 = vmatmul.mubr.msk.f32.gmra.mxu1 %vm277_vm2, %v417_v57  ;;  %2993 = vmatprep.subr.mxu1 %v715_v10 }
 0x144   :  { %529 = vmatprep.mubr.f32.mxu1 %v3171_v54  ;;  %2994 = vmatpush3.msra.mxu1 %v699_v11 }
 0x145   :  { %2995 = vmatprep.subr.mxu1 %v714_v12 }
 0x146   :  { %2996 = vmatpush3.msra.mxu1 %v698_v13 }
 0x147   :  { %2579 = vmatmul.mubr.msk.f32.gmra.mxu1 %vm277_vm2, %v418_v58  ;;  %2997 = vmatprep.subr.mxu1 %v713_v14 }
 0x148   :  { %535 = vmatprep.mubr.f32.mxu1 %v3171_v54  ;;  %2998 = vmatpush3.msra.mxu1 %v697_v15 }
 0x149   :  { %2999 = vmatprep.subr.mxu1 %v712_v16 }
 0x14a   :  { %3000 = vmatpush3.msra.mxu1 %v696_v17 }
 0x14b   :  { %2580 = vmatmul.mubr.msk.f32.gmra.mxu1 %vm277_vm2, %v419_v59  ;;  %3001 = vmatprep.subr.mxu1 %v711_v18 }
 0x14c   :  { %541 = vmatprep.mubr.f32.mxu1 %v3171_v54  ;;  %3002 = vmatpush3.msra.mxu1 %v695_v20 }
 0x14d   :  { %3003 = vmatprep.subr.mxu1 %v710_v22 }
 0x14e   :  { %3004 = vmatpush3.msra.mxu1 %v694_v24 }
 0x14f   :  { %2581 = vmatmul.mubr.msk.f32.gmra.mxu1 %vm277_vm2, %v420_v60  ;;  %3005 = vmatprep.subr.mxu1 %v709_v26 }
 0x150   :  { %547 = vmatprep.mubr.f32.mxu1 %v3171_v54  ;;  %3006 = vmatpush3.msra.mxu1 %v693_v28 }
 0x151   :  { %3007 = vmatprep.subr.mxu1 %v708_v30 }
 0x152   :  { %3008 = vmatpush3.msra.mxu1 %v692_v32 }
 0x153   :  { %2582 = vmatmul.mubr.msk.f32.gmra.mxu1 %vm277_vm2, %v421_v61  ;;  %3009 = vmatprep.subr.mxu1 %v707_v34 }
 0x154   :  { %553 = vmatprep.mubr.f32.mxu1 %v3171_v54  ;;  %3010 = vmatpush3.msra.mxu1 %v691_v36 }
 0x155   :  { %3011 = vmatprep.subr.mxu1 %v706_v38 }
 0x156   :  { %3012 = vmatpush3.msra.mxu1 %v690_v40 }
 0x157   :  { %2583 = vmatmul.mubr.msk.f32.gmra.mxu1 %vm277_vm2, %v422_v62  ;;  %3013 = vmatprep.subr.mxu1 %v705_v46 }
 0x158   :  { %3014 = vmatpush3.msra.mxu1 %v689_v47 }
 0x159   :  { %3015 = vmatprep.subr.mxu1 %v704_v48 }
 0x15a   :  { %3016 = vmatpush3.msra.mxu1 %v688_v49 }
 0x1db   :  { %v3660_v50 = vpop.f32.mrf.mxu1 }
 0x1dd   :  { %v3662_v51 = vpop.f32.mrf.mxu1 }
 0x1df   :  { %v3664_v52 = vpop.f32.mrf.mxu1 }
 0x1e1   :  { %v3666_v53 = vpop.f32.mrf.mxu1 }
 0x1e3   :  { %v3668_v55 = vpop.f32.mrf.mxu1 }
 0x1e5   :  { %v382_v56 = vpop.f32.mrf.mxu1 }
 0x1e7   :  { %v386_v57 = vpop.f32.mrf.mxu1 }
 0x1e9   :  { %v388_v58 = vpop.f32.mrf.mxu1 }
 0x1eb   :  { %v392_v59 = vpop.f32.mrf.mxu1 }
 0x1ed   :  { %v394_v60 = vpop.f32.mrf.mxu1 }
 0x1ef   :  { %v398_v61 = vpop.f32.mrf.mxu1 }
 0x1f0   :  { %v570_v46 = vmax.f32 %v3434_v29, %v398_v61  ;;  %v566_v29 = vmax.f32 %v3446_v37, %v386_v57  ;;  %v563_v37 = vmax.f32 %v3455_v42, %v3666_v53  ;;  %v560_v42 = vmax.f32 %v3464_v45, %v3660_v50  ;;  %v594_v45 = vld [vmem:[%s5217_s5 + $0x8] sm:$0xff]  ;;  %v595_v50 = vld [vmem:[%s5217_s5 + $0x10] sm:$0x3f]  ;;  %v2663_v61 = vld [vmem:[%s5218_s6 + $0x2f8] sm:$0xff] }
 0x1f1   :  { %v400_v62 = vpop.f32.mrf.mxu1 }
 0x1f2   :  { %v571_v38 = vmax.f32 %v3431_v27, %v400_v62  ;;  %v567_v27 = vmax.f32 %v3443_v35, %v388_v58  ;;  %v2647_v62 = vld [vmem:[%s5218_s6 + $0x278] sm:$0xff] }
 0x1f3   :  { %v404_v63 = vpop.f32.mrf.mxu1 }
 0x1f4   :  { %v572_v34 = vmax.f32 %v3428_v25, %v404_v63  ;;  %v2662_v63 = vld [vmem:[%s5218_s6 + $0x2f0] sm:$0xff] }
 0x1f5   :  { %v406_v0 = vpop.f32.mrf.mxu1 }
 0x1f6   :  { %v573_v30 = vmax.f32 %v3425_v23, %v406_v0  ;;  %v568_v23 = vmax.f32 %v3440_v33, %v392_v59  ;;  %v564_v33 = vmax.f32 %v3452_v41, %v3668_v55  ;;  %v561_v41 = vmax.f32 %v3461_v44, %v3662_v51  ;;  %v593_v44 = vld [vmem:[%s5217_s5] sm:$0xff]  ;;  %v2626_v51 = vld [vmem:[%s5217_s5 + $0x30] sm:$0xff] }
 0x1f7   :  { %v410_v1 = vpop.f32.mrf.mxu1  ;;  %v2628_v59 = vld [vmem:[%s5217_s5 + $0x40] sm:$0x3f]  ;;  %v2646_v0 = vld [vmem:[%s5218_s6 + $0x270] sm:$0xff] }
 0x1f8   :  { %v574_v26 = vmax.f32 %v3423_v21, %v410_v1  ;;  %v2661_v1 = vld [vmem:[%s5218_s6 + $0x2e8] sm:$0xff] }
 0x1f9   :  { %v412_v3 = vpop.f32.mrf.mxu1 }
 0x1fa   :  { %v575_v24 = vmax.f32 %v3421_v19, %v412_v3  ;;  %v569_v19 = vmax.f32 %v3437_v31, %v394_v60  ;;  %v565_v31 = vmax.f32 %v3449_v39, %v382_v56  ;;  %v562_v39 = vmax.f32 %v3458_v43, %v3664_v52  ;;  %v2627_v52 = vld [vmem:[%s5217_s5 + $0x38] sm:$0xff]  ;;  %v2645_v3 = vld [vmem:[%s5218_s6 + $0x268] sm:$0xff] }
 0x1fb   :  { %v513_v4 = vpop.f32.mrf.mxu1 }
 0x1fc   :  { %v3731_v43 = vmax.f32 %v560_v42, %v513_v4  ;;  %v2660_v4 = vld [vmem:[%s5218_s6 + $0x2e0] sm:$0xff]  ;;  %v2615_v42 = vld [vmem:[%s5218_s6 + $0x1a8] sm:$0xff] }
 0x1fd   :  { %v515_v6 = vpop.f32.mrf.mxu1 }
 0x1fe   :  { %v3728_v58 = vmax.f32 %v561_v41, %v515_v6  ;;  %v2644_v6 = vld [vmem:[%s5218_s6 + $0x260] sm:$0xff]  ;;  %v2616_v41 = vld [vmem:[%s5218_s6 + $0x1b0] sm:$0xff] }
 0x1ff   :  { %v519_v7 = vpop.f32.mrf.mxu1 }
 0x200   :  { %v3725_v53 = vmax.f32 %v562_v39, %v519_v7  ;;  %v2659_v7 = vld [vmem:[%s5218_s6 + $0x2d8] sm:$0xff]  ;;  %v2638_v39 = vld [vmem:[%s5218_s6 + $0x230] sm:$0xff] }
 0x201   :  { %v521_v9 = vpop.f32.mrf.mxu1 }
 0x202   :  { %v3720_v55 = vmax.f32 %v563_v37, %v521_v9  ;;  %v2643_v9 = vld [vmem:[%s5218_s6 + $0x258] sm:$0xff] }
 0x203   :  { %v525_v10 = vpop.f32.mrf.mxu1  ;;  %v2639_v37 = vld [vmem:[%s5218_s6 + $0x238] sm:$0xff] }
 0x204   :  { %v3715_v56 = vmax.f32 %v564_v33, %v525_v10  ;;  %v2658_v10 = vld [vmem:[%s5218_s6 + $0x2d0] sm:$0xff]  ;;  %v2601_v33 = vld [vmem:[%s5218_s6 + $0x138] sm:$0xff] }
 0x205   :  { %v527_v11 = vpop.f32.mrf.mxu1 }
 0x206   :  { %v3710_v57 = vmax.f32 %v565_v31, %v527_v11  ;;  %v2642_v11 = vld [vmem:[%s5218_s6 + $0x250] sm:$0xff]  ;;  %v2640_v31 = vld [vmem:[%s5218_s6 + $0x240] sm:$0xff] }
 0x207   :  { %v531_v12 = vpop.f32.mrf.mxu1 }
 0x208   :  { %v3705_v35 = vmax.f32 %v566_v29, %v531_v12  ;;  %v2657_v12 = vld [vmem:[%s5218_s6 + $0x2c8] sm:$0xff]  ;;  %v2602_v29 = vld [vmem:[%s5218_s6 + $0x140] sm:$0xff] }
 0x209   :  { %v533_v13 = vpop.f32.mrf.mxu1 }
 0x20a   :  { %v3700_v60 = vmax.f32 %v567_v27, %v533_v13  ;;  %v2641_v13 = vld [vmem:[%s5218_s6 + $0x248] sm:$0xff] }
 0x20b   :  { %v537_v14 = vpop.f32.mrf.mxu1  ;;  %v2603_v27 = vld [vmem:[%s5218_s6 + $0x148] sm:$0xff] }
 0x20c   :  { %v3696_v49 = vmax.f32 %v568_v23, %v537_v14  ;;  %v2604_v23 = vld [vmem:[%s5218_s6 + $0x150] sm:$0xff] }
 0x20d   :  { %v539_v15 = vpop.f32.mrf.mxu1 }
 0x20e   :  { %v3692_v48 = vmax.f32 %v569_v19, %v539_v15  ;;  %v2605_v19 = vld [vmem:[%s5218_s6 + $0x158] sm:$0xff] }
 0x20f   :  { %v543_v16 = vpop.f32.mrf.mxu1 }
 0x210   :  { %v3688_v25 = vmax.f32 %v570_v46, %v543_v16  ;;  %v2590_v46 = vld [vmem:[%s5217_s5 + $0x28] sm:$0x3f] }
 0x211   :  { %v545_v17 = vpop.f32.mrf.mxu1 }
 0x212   :  { %v3684_v21 = vmax.f32 %v571_v38, %v545_v17  ;;  %v2622_v38 = vld [vmem:[%s5218_s6 + $0x1e0] sm:$0xff] }
 0x213   :  { %v549_v18 = vpop.f32.mrf.mxu1 }
 0x214   :  { %v3680_v47 = vmax.f32 %v572_v34, %v549_v18  ;;  %v2623_v34 = vld [vmem:[%s5218_s6 + $0x1e8] sm:$0xff] }
 0x215   :  { %v551_v20 = vpop.f32.mrf.mxu1 }
 0x216   :  { %v3677_v40 = vmax.f32 %v573_v30, %v551_v20  ;;  %v2608_v30 = vld [vmem:[%s5218_s6 + $0x170] sm:$0xff] }
 0x217   :  { %v555_v22 = vpop.f32.mrf.mxu1 }
 0x218   :  { %v3674_v36 = vmax.f32 %v574_v26, %v555_v22  ;;  %v2588_v22 = vld [vmem:[%s5217_s5 + $0x18] sm:$0xff] }
 0x219   :  { %v557_v28 = vpop.f32.mrf.mxu1  ;;  %v2609_v26 = vld [vmem:[%s5218_s6 + $0x178] sm:$0xff] }
 0x21a   :  { %v591_v32 = vmax.f32 %v575_v24, %v557_v28  ;;  %v2625_v24 = vld [vmem:[%s5218_s6 + $0x1f8] sm:$0xff]  ;;  %v2624_v28 = vld [vmem:[%s5218_s6 + $0x1f0] sm:$0xff] }
 0x21c   :  { %621 = vmatprep.subr.mxu0 %v591_v32  ;;  %838 = vmatprep.subr.mxu1 %v591_v32 }
 0x21d   :  { %622 = vmatpush1.msra.mxu0 %v3674_v36 }
 0x21e   :  { %623 = vmatprep.subr.mxu0 %v3677_v40 }
 0x21f   :  { %624 = vmatpush1.msra.mxu0 %v3680_v47 }
 0x220   :  { %625 = vmatprep.subr.mxu0 %v3684_v21 }
 0x221   :  { %626 = vmatpush1.msra.mxu0 %v3688_v25 }
 0x222   :  { %627 = vmatprep.subr.mxu0 %v3692_v48 }
 0x223   :  { %628 = vmatpush1.msra.mxu0 %v3696_v49 }
 0x224   :  { %629 = vmatprep.subr.mxu0 %v3700_v60 }
 0x225   :  { %630 = vmatpush1.msra.mxu0 %v3705_v35 }
 0x226   :  { %631 = vmatprep.subr.mxu0 %v3710_v57 }
 0x227   :  { %632 = vmatpush1.msra.mxu0 %v3715_v56 }
 0x228   :  { %633 = vmatprep.subr.mxu0 %v3720_v55 }
 0x229   :  { %634 = vmatpush1.msra.mxu0 %v3725_v53 }
 0x22a   :  { %635 = vmatprep.subr.mxu0 %v3728_v58 }
 0x22b   :  { %636 = vmatpush1.msra.mxu0 %v3731_v43 }
 0x22c   :  { %2584 = vmatmul.mubr.msk.f32.vlgmr.msra.gmra.mxu0 %vm277_vm2, %v593_v44  ;;  %1050 = vmatprep.subr.mxu0 %v591_v32  ;;  %v2589_v32 = vld [vmem:[%s5217_s5 + $0x20] sm:$0xff] }
 0x22d   :  { %1051 = vmatpush1.msra.mxu0 %v3674_v36  ;;  %675 = vmatprep.mubr.f32.mxu0 %v3171_v54  ;;  %v2636_v44 = vld [vmem:[%s5218_s6 + $0x220] sm:$0xff] }
 0x22e   :  { %1052 = vmatprep.subr.mxu0 %v3677_v40 }
 0x22f   :  { %1053 = vmatpush1.msra.mxu0 %v3680_v47 }
 0x230   :  { %1054 = vmatprep.subr.mxu0 %v3684_v21  ;;  %2585 = vmatmul.mubr.msk.f32.gmra.mxu0 %vm277_vm2, %v594_v45  ;;  %v2651_v45 = vld [vmem:[%s5218_s6 + $0x298] sm:$0xff] }
 0x231   :  { %1055 = vmatpush1.msra.mxu0 %v3688_v25  ;;  %681 = vmatprep.mubr.f32.mxu0 %v3171_v54 }
 0x232   :  { %1056 = vmatprep.subr.mxu0 %v3692_v48 }
 0x233   :  { %1057 = vmatpush1.msra.mxu0 %v3696_v49 }
 0x234   :  { %1058 = vmatprep.subr.mxu0 %v3700_v60  ;;  %2586 = vmatmul.mubr.msk.f32.gmra.mxu0 %vm277_vm2, %v595_v50  ;;  %v2614_v50 = vld [vmem:[%s5218_s6 + $0x1a0] sm:$0xff] }
 0x235   :  { %1059 = vmatpush1.msra.mxu0 %v3705_v35  ;;  %1098 = vmatprep.mubr.f32.mxu0 %v3171_v54 }
 0x236   :  { %1060 = vmatprep.subr.mxu0 %v3710_v57 }
 0x237   :  { %1061 = vmatpush1.msra.mxu0 %v3715_v56 }
 0x238   :  { %1062 = vmatprep.subr.mxu0 %v3720_v55 }
 0x239   :  { %1063 = vmatpush1.msra.mxu0 %v3725_v53 }
 0x23a   :  { %1064 = vmatprep.subr.mxu0 %v3728_v58 }
 0x23b   :  { %1065 = vmatpush1.msra.mxu0 %v3731_v43 }
 0x23c   :  { %2629 = vmatmul.mubr.msk.f32.vlgmr.msra.gmra.mxu0 %vm277_vm2, %v2626_v51  ;;  %3067 = vmatprep.subr.mxu0 %v2663_v61  ;;  %v2598_v51 = vld [vmem:[%s5218_s6 + $0x120] sm:$0xff]  ;;  %v2635_v61 = vld [vmem:[%s5218_s6 + $0x218] sm:$0xff] }
 0x23d   :  { %1104 = vmatprep.mubr.f32.mxu0 %v3171_v54  ;;  %3068 = vmatpush3.msra.mxu0 %v2647_v62  ;;  %v2650_v62 = vld [vmem:[%s5218_s6 + $0x290] sm:$0xff] }
 0x23e   :  { %3069 = vmatprep.subr.mxu0 %v2662_v63  ;;  %v2634_v63 = vld [vmem:[%s5218_s6 + $0x210] sm:$0xff] }
 0x23f   :  { %3070 = vmatpush3.msra.mxu0 %v2646_v0  ;;  %v2649_v0 = vld [vmem:[%s5218_s6 + $0x288] sm:$0xff] }
 0x240   :  { %2630 = vmatmul.mubr.msk.f32.gmra.mxu0 %vm277_vm2, %v2627_v52  ;;  %3071 = vmatprep.subr.mxu0 %v2661_v1  ;;  %v2613_v52 = vld [vmem:[%s5218_s6 + $0x198] sm:$0xff]  ;;  %v2612_v1 = vld [vmem:[%s5218_s6 + $0x190] sm:$0xff] }
 0x241   :  { %1110 = vmatprep.mubr.f32.mxu0 %v3171_v54  ;;  %3072 = vmatpush3.msra.mxu0 %v2645_v3  ;;  %v2596_v3 = vld [vmem:[%s5218_s6 + $0x110] sm:$0xff] }
 0x242   :  { %3073 = vmatprep.subr.mxu0 %v2660_v4 }
 0x243   :  { %3074 = vmatpush3.msra.mxu0 %v2644_v6  ;;  %v2633_v6 = vld [vmem:[%s5218_s6 + $0x208] sm:$0xff] }
 0x244   :  { %2631 = vmatmul.mubr.msk.f32.gmra.mxu0 %vm277_vm2, %v2628_v59  ;;  %3075 = vmatprep.subr.mxu0 %v2659_v7  ;;  %v2597_v59 = vld [vmem:[%s5218_s6 + $0x118] sm:$0xff]  ;;  %v2648_v7 = vld [vmem:[%s5218_s6 + $0x280] sm:$0xff] }
 0x245   :  { %3076 = vmatpush3.msra.mxu0 %v2643_v9  ;;  %v2611_v9 = vld [vmem:[%s5218_s6 + $0x188] sm:$0xff] }
 0x246   :  { %3077 = vmatprep.subr.mxu0 %v2658_v10 }
 0x247   :  { %3078 = vmatpush3.msra.mxu0 %v2642_v11  ;;  %v2632_v11 = vld [vmem:[%s5218_s6 + $0x200] sm:$0xff] }
 0x248   :  { %3079 = vmatprep.subr.mxu0 %v2657_v12  ;;  %v2595_v12 = vld [vmem:[%s5218_s6 + $0x108] sm:$0xff] }
 0x249   :  { %3080 = vmatpush3.msra.mxu0 %v2641_v13  ;;  %v2610_v13 = vld [vmem:[%s5218_s6 + $0x180] sm:$0xff] }
 0x2ec   :  { %v671_v14 = vpop.f32.mrf.mxu0 }
 0x2ee   :  { %v673_v15 = vpop.f32.mrf.mxu0 }
 0x2ef   :  { %784 = vmatprep.mubr.f32.mxu1 %v673_v15 }
 0x2f0   :  { %785 = vmatmul.mubr.f32.vlgmr.msra.gmra.mxu1 %v671_v14  ;;  %v677_v16 = vpop.f32.mrf.mxu0  ;;  %v2594_v14 = vld [vmem:[%s5218_s6 + $0x100] sm:$0xff] }
 0x2f1   :  { %839 = vmatpush1.msra.mxu1 %v3674_v36  ;;  %v2607_v36 = vld [vmem:[%s5218_s6 + $0x168] sm:$0xff] }
 0x2f2   :  { %840 = vmatprep.subr.mxu1 %v3677_v40  ;;  %v679_v17 = vpop.f32.mrf.mxu0  ;;  %v2606_v40 = vld [vmem:[%s5218_s6 + $0x160] sm:$0xff] }
 0x2f3   :  { %841 = vmatpush1.msra.mxu1 %v3680_v47  ;;  %789 = vmatprep.mubr.f32.mxu1 %v679_v17  ;;  %v2621_v47 = vld [vmem:[%s5218_s6 + $0x1d8] sm:$0xff] }
 0x2f4   :  { %842 = vmatprep.subr.mxu1 %v3684_v21  ;;  %v683_v18 = vpop.f32.mrf.mxu0  ;;  %790 = vmatmul.mubr.f32.gmra.mxu1 %v677_v16  ;;  %v2620_v21 = vld [vmem:[%s5218_s6 + $0x1d0] sm:$0xff] }
 0x2f5   :  { %843 = vmatpush1.msra.mxu1 %v3688_v25  ;;  %v2619_v25 = vld [vmem:[%s5218_s6 + $0x1c8] sm:$0xff] }
 0x2f6   :  { %844 = vmatprep.subr.mxu1 %v3692_v48  ;;  %v685_v20 = vpop.f32.mrf.mxu0  ;;  %v2618_v48 = vld [vmem:[%s5218_s6 + $0x1c0] sm:$0xff] }
 0x2f7   :  { %845 = vmatpush1.msra.mxu1 %v3696_v49  ;;  %794 = vmatprep.mubr.f32.mxu1 %v685_v20  ;;  %v2656_v49 = vld [vmem:[%s5218_s6 + $0x2c0] sm:$0xff]  ;;  %v2695_v20 = vld [vmem:[%s5220_s8 + $0x1f8] sm:$0xff] }
 0x2f8   :  { %846 = vmatprep.subr.mxu1 %v3700_v60  ;;  %795 = vmatmul.mubr.f32.gmra.mxu1 %v683_v18  ;;  %v2617_v60 = vld [vmem:[%s5218_s6 + $0x1b8] sm:$0xff] }
 0x2f9   :  { %847 = vmatpush1.msra.mxu1 %v3705_v35  ;;  %886 = vmatprep.mubr.f32.mxu1 %v3171_v54  ;;  %v2655_v35 = vld [vmem:[%s5218_s6 + $0x2b8] sm:$0xff] }
 0x2fa   :  { %848 = vmatprep.subr.mxu1 %v3710_v57  ;;  %3081 = vmatprep.subr.mxu0 %v2656_v49  ;;  %v2654_v57 = vld [vmem:[%s5218_s6 + $0x2b0] sm:$0xff]  ;;  %v2740_v49 = vld [vmem:[%s5220_s8 + $0x360] sm:$0xff] }
 0x2fb   :  { %849 = vmatpush1.msra.mxu1 %v3715_v56  ;;  %3082 = vmatpush3.msra.mxu0 %v2640_v31  ;;  %v2653_v56 = vld [vmem:[%s5218_s6 + $0x2a8] sm:$0xff] }
 0x2fc   :  { %850 = vmatprep.subr.mxu1 %v3720_v55  ;;  %3083 = vmatprep.subr.mxu0 %v2655_v35  ;;  %v2600_v55 = vld [vmem:[%s5218_s6 + $0x130] sm:$0xff]  ;;  %v1100_v4 = vpop.f32.mrf.mxu0 }
 0x2fd   :  { %851 = vmatpush1.msra.mxu1 %v3725_v53  ;;  %3084 = vmatpush3.msra.mxu0 %v2639_v37  ;;  %v2599_v53 = vld [vmem:[%s5218_s6 + $0x128] sm:$0xff] }
 0x2fe   :  { %852 = vmatprep.subr.mxu1 %v3728_v58  ;;  %3085 = vmatprep.subr.mxu0 %v2654_v57  ;;  %v2637_v58 = vld [vmem:[%s5218_s6 + $0x228] sm:$0xff]  ;;  %v1102_v10 = vpop.f32.mrf.mxu0 }
 0x2ff   :  { %853 = vmatpush1.msra.mxu1 %v3731_v43  ;;  %3086 = vmatpush3.msra.mxu0 %v2638_v39  ;;  %v2652_v43 = vld [vmem:[%s5218_s6 + $0x2a0] sm:$0xff] }
 0x300   :  { %2591 = vmatmul.mubr.msk.f32.vlgmr.msra.gmra.mxu1 %vm277_vm2, %v2588_v22  ;;  %3026 = vmatprep.subr.mxu1 %v2625_v24  ;;  %v1106_v15 = vpop.f32.mrf.mxu0  ;;  %v2759_v22 = vld [vmem:[%s5220_s8 + $0x3f8] sm:$0xff]  ;;  %v2758_v24 = vld [vmem:[%s5220_s8 + $0x3f0] sm:$0xff] }
 0x301   :  { %892 = vmatprep.mubr.f32.mxu1 %v3171_v54  ;;  %3027 = vmatpush3.msra.mxu1 %v2609_v26  ;;  %v2757_v26 = vld [vmem:[%s5220_s8 + $0x3e8] sm:$0xff] }
 0x302   :  { %3028 = vmatprep.subr.mxu1 %v2624_v28  ;;  %3087 = vmatprep.subr.mxu0 %v2653_v56  ;;  %v1108_v16 = vpop.f32.mrf.mxu0  ;;  %v2756_v28 = vld [vmem:[%s5220_s8 + $0x3e0] sm:$0xff] }
 0x303   :  { %3029 = vmatpush3.msra.mxu1 %v2608_v30  ;;  %3088 = vmatpush3.msra.mxu0 %v2637_v58  ;;  %v2755_v30 = vld [vmem:[%s5220_s8 + $0x3d8] sm:$0xff] }
 0x304   :  { %2592 = vmatmul.mubr.msk.f32.gmra.mxu1 %vm277_vm2, %v2589_v32  ;;  %3030 = vmatprep.subr.mxu1 %v2623_v34  ;;  %v1112_v17 = vpop.f32.mrf.mxu0  ;;  %v2754_v32 = vld [vmem:[%s5220_s8 + $0x3d0] sm:$0xff]  ;;  %v2753_v34 = vld [vmem:[%s5220_s8 + $0x3c8] sm:$0xff] }
 0x305   :  { %898 = vmatprep.mubr.f32.mxu1 %v3171_v54  ;;  %3031 = vmatpush3.msra.mxu1 %v2607_v36  ;;  %v2752_v36 = vld [vmem:[%s5220_s8 + $0x3c0] sm:$0xff] }
 0x306   :  { %3032 = vmatprep.subr.mxu1 %v2622_v38  ;;  %3089 = vmatprep.subr.mxu0 %v2652_v43  ;;  %v1114_v18 = vpop.f32.mrf.mxu0  ;;  %v2751_v38 = vld [vmem:[%s5220_s8 + $0x3b8] sm:$0xff]  ;;  %v2694_v43 = vld [vmem:[%s5220_s8 + $0x1f0] sm:$0xff] }
 0x307   :  { %3033 = vmatpush3.msra.mxu1 %v2606_v40  ;;  %3090 = vmatpush3.msra.mxu0 %v2636_v44  ;;  %v2750_v40 = vld [vmem:[%s5220_s8 + $0x3b0] sm:$0xff]  ;;  %v2693_v44 = vld [vmem:[%s5220_s8 + $0x1e8] sm:$0xff] }
 0x308   :  { %2593 = vmatmul.mubr.msk.f32.gmra.mxu1 %vm277_vm2, %v2590_v46  ;;  %3034 = vmatprep.subr.mxu1 %v2621_v47  ;;  %v2749_v46 = vld [vmem:[%s5220_s8 + $0x3a8] sm:$0xff]  ;;  %v2748_v47 = vld [vmem:[%s5220_s8 + $0x3a0] sm:$0xff] }
 0x309   :  { %3035 = vmatpush3.msra.mxu1 %v2605_v19  ;;  %3091 = vmatprep.subr.mxu0 %v2651_v45  ;;  %v2747_v19 = vld [vmem:[%s5220_s8 + $0x398] sm:$0xff] }
 0x30a   :  { %3036 = vmatprep.subr.mxu1 %v2620_v21  ;;  %3092 = vmatpush3.msra.mxu0 %v2635_v61  ;;  %v2746_v21 = vld [vmem:[%s5220_s8 + $0x390] sm:$0xff]  ;;  %v2689_v61 = vld [vmem:[%s5220_s8 + $0x1c8] sm:$0xff] }
 0x30b   :  { %3037 = vmatpush3.msra.mxu1 %v2604_v23  ;;  %3093 = vmatprep.subr.mxu0 %v2650_v62  ;;  %v2745_v23 = vld [vmem:[%s5220_s8 + $0x388] sm:$0xff] }
 0x30c   :  { %3038 = vmatprep.subr.mxu1 %v2619_v25  ;;  %3094 = vmatpush3.msra.mxu0 %v2634_v63  ;;  %v2744_v25 = vld [vmem:[%s5220_s8 + $0x380] sm:$0xff] }
 0x30d   :  { %3039 = vmatpush3.msra.mxu1 %v2603_v27  ;;  %3095 = vmatprep.subr.mxu0 %v2649_v0  ;;  %v2743_v27 = vld [vmem:[%s5220_s8 + $0x378] sm:$0xff]  ;;  %v2688_v63 = vld [vmem:[%s5220_s8 + $0x1c0] sm:$0xff] }
 0x30e   :  { %3040 = vmatprep.subr.mxu1 %v2618_v48  ;;  %3096 = vmatpush3.msra.mxu0 %v2633_v6  ;;  %v2742_v48 = vld [vmem:[%s5220_s8 + $0x370] sm:$0xff]  ;;  %v2687_v0 = vld [vmem:[%s5220_s8 + $0x1b8] sm:$0xff]  ;;  %v2684_v6 = vld [vmem:[%s5220_s8 + $0x1a0] sm:$0xff] }
 0x30f   :  { %3041 = vmatpush3.msra.mxu1 %v2602_v29  ;;  %3097 = vmatprep.subr.mxu0 %v2648_v7  ;;  %v2741_v29 = vld [vmem:[%s5220_s8 + $0x368] sm:$0xff]  ;;  %v2683_v7 = vld [vmem:[%s5220_s8 + $0x198] sm:$0xff] }
 0x310   :  { %3042 = vmatprep.subr.mxu1 %v2617_v60  ;;  %3098 = vmatpush3.msra.mxu0 %v2632_v11  ;;  %v2680_v11 = vld [vmem:[%s5220_s8 + $0x180] sm:$0xff] }
 0x311   :  { %3043 = vmatpush3.msra.mxu1 %v2601_v33  ;;  %1214 = vmatprep.mubr.f32.mxu0 %v1102_v10  ;;  %v2681_v10 = vld [vmem:[%s5220_s8 + $0x188] sm:$0xff] }
 0x312   :  { %3044 = vmatprep.subr.mxu1 %v2616_v41  ;;  %1215 = vmatmul.mubr.f32.vlgmr.msra.gmra.mxu0 %v1100_v4  ;;  %v2685_v4 = vld [vmem:[%s5220_s8 + $0x1a8] sm:$0xff] }
 0x313   :  { %3045 = vmatpush3.msra.mxu1 %v2600_v55  ;;  %1219 = vmatprep.mubr.f32.mxu0 %v1108_v16  ;;  %v4073_v55 = vld [vmem:[%s5219_s7] ss:$0 sm:$0xff]  ;;  %v2675_v16 = vld [vmem:[%s5220_s8 + $0x158] sm:$0xff] }
 0x314   :  { %3046 = vmatprep.subr.mxu1 %v2615_v42  ;;  %1443 = vmatprep.subr.mxu0 %v2759_v22  ;;  %v2673_v22 = vld [vmem:[%s5220_s8 + $0x148] sm:$0xff] }
 0x315   :  { %3047 = vmatpush3.msra.mxu1 %v2599_v53  ;;  %1444 = vmatpush1.msra.mxu0 %v2758_v24  ;;  %v2737_v24 = vld [vmem:[%s5220_s8 + $0x348] sm:$0xff] }
 0x316   :  { %3048 = vmatprep.subr.mxu1 %v2614_v50  ;;  %1220 = vmatmul.mubr.f32.gmra.mxu0 %v1106_v15  ;;  %v2692_v50 = vld [vmem:[%s5220_s8 + $0x1e0] sm:$0xff] }
 0x317   :  { %3049 = vmatpush3.msra.mxu1 %v2598_v51  ;;  %1224 = vmatprep.mubr.f32.mxu0 %v1114_v18  ;;  %v2691_v51 = vld [vmem:[%s5220_s8 + $0x1d8] sm:$0xff]  ;;  %v2676_v15 = vld [vmem:[%s5220_s8 + $0x160] sm:$0xff]  ;;  %v2674_v18 = vld [vmem:[%s5220_s8 + $0x150] sm:$0xff] }
 0x318   :  { %3050 = vmatprep.subr.mxu1 %v2613_v52  ;;  %1445 = vmatprep.subr.mxu0 %v2757_v26  ;;  %v2672_v26 = vld [vmem:[%s5220_s8 + $0x140] sm:$0xff] }
 0x319   :  { %3051 = vmatpush3.msra.mxu1 %v2597_v59  ;;  %1446 = vmatpush1.msra.mxu0 %v2756_v28  ;;  %v2690_v59 = vld [vmem:[%s5220_s8 + $0x1d0] sm:$0xff]  ;;  %v2736_v28 = vld [vmem:[%s5220_s8 + $0x340] sm:$0xff] }
 0x31a   :  { %3052 = vmatprep.subr.mxu1 %v2612_v1  ;;  %1225 = vmatmul.mubr.f32.gmra.mxu0 %v1112_v17  ;;  %v2739_v17 = vld [vmem:[%s5220_s8 + $0x358] sm:$0xff] }
 0x31b   :  { %3053 = vmatpush3.msra.mxu1 %v2596_v3  ;;  %1507 = vmatprep.mubr.f32.mxu0 %v3171_v54  ;;  %v2686_v3 = vld [vmem:[%s5220_s8 + $0x1b0] sm:$0xff] }
 0x31c   :  { %3054 = vmatprep.subr.mxu1 %v2611_v9  ;;  %1447 = vmatprep.subr.mxu0 %v2755_v30  ;;  %v2682_v9 = vld [vmem:[%s5220_s8 + $0x190] sm:$0xff]  ;;  %v2671_v30 = vld [vmem:[%s5220_s8 + $0x138] sm:$0xff] }
 0x31d   :  { %3055 = vmatpush3.msra.mxu1 %v2595_v12  ;;  %1448 = vmatpush1.msra.mxu0 %v2754_v32  ;;  %v2679_v12 = vld [vmem:[%s5220_s8 + $0x178] sm:$0xff] }
 0x31e   :  { %3056 = vmatprep.subr.mxu1 %v2610_v13  ;;  %1449 = vmatprep.subr.mxu0 %v2753_v34  ;;  %v2678_v13 = vld [vmem:[%s5220_s8 + $0x170] sm:$0xff]  ;;  %v2735_v32 = vld [vmem:[%s5220_s8 + $0x338] sm:$0xff] }
 0x31f   :  { %3057 = vmatpush3.msra.mxu1 %v2594_v14  ;;  %1450 = vmatpush1.msra.mxu0 %v2752_v36  ;;  %v2677_v14 = vld [vmem:[%s5220_s8 + $0x168] sm:$0xff]  ;;  %v2670_v34 = vld [vmem:[%s5220_s8 + $0x130] sm:$0xff] }
 0x320   :  { %1304 = vmatprep.subr.mxu1 %v2695_v20  ;;  %1451 = vmatprep.subr.mxu0 %v2751_v38  ;;  %v2738_v20 = vld [vmem:[%s5220_s8 + $0x350] sm:$0xff]  ;;  %v2669_v38 = vld [vmem:[%s5220_s8 + $0x128] sm:$0xff] }
 0x321   :  { %1452 = vmatpush1.msra.mxu0 %v2750_v40  ;;  %v2734_v36 = vld [vmem:[%s5220_s8 + $0x330] sm:$0xff]  ;;  %v2733_v40 = vld [vmem:[%s5220_s8 + $0x328] sm:$0xff] }
 0x322   :  { %1453 = vmatprep.subr.mxu0 %v2749_v46  ;;  %v2668_v46 = vld [vmem:[%s5220_s8 + $0x120] sm:$0xff] }
 0x323   :  { %1454 = vmatpush1.msra.mxu0 %v2748_v47  ;;  %v2732_v47 = vld [vmem:[%s5220_s8 + $0x320] sm:$0xff] }
 0x324   :  { %1455 = vmatprep.subr.mxu0 %v2747_v19  ;;  %v2667_v19 = vld [vmem:[%s5220_s8 + $0x118] sm:$0xff] }
 0x325   :  { %1456 = vmatpush1.msra.mxu0 %v2746_v21  ;;  %v2731_v21 = vld [vmem:[%s5220_s8 + $0x318] sm:$0xff] }
 0x326   :  { %1457 = vmatprep.subr.mxu0 %v2745_v23  ;;  %v2666_v23 = vld [vmem:[%s5220_s8 + $0x110] sm:$0xff] }
 0x327   :  { %1458 = vmatpush1.msra.mxu0 %v2744_v25  ;;  %v2730_v25 = vld [vmem:[%s5220_s8 + $0x310] sm:$0xff] }
 0x328   :  { %1459 = vmatprep.subr.mxu0 %v2743_v27  ;;  %v2665_v27 = vld [vmem:[%s5220_s8 + $0x108] sm:$0xff] }
 0x329   :  { %1460 = vmatpush1.msra.mxu0 %v2742_v48  ;;  %v2729_v48 = vld [vmem:[%s5220_s8 + $0x308] sm:$0xff] }
 0x32a   :  { %1461 = vmatprep.subr.mxu0 %v2741_v29  ;;  %v2664_v29 = vld [vmem:[%s5220_s8 + $0x100] sm:$0xff] }
 0x32b   :  { %1462 = vmatpush1.msra.mxu0 %v2740_v49  ;;  %v2728_v49 = vld [vmem:[%s5220_s8 + $0x300] sm:$0xff] }
 0x32c   :  { %1463 = vmatprep.subr.mxu0 %v2739_v17 }
 0x32d   :  { %1464 = vmatpush1.msra.mxu0 %v2738_v20  ;;  %v2876_v20 = vld [vmem:[%s5220_s8 + $0x7a0] sm:$0xff] }
 0x32e   :  { %1465 = vmatprep.subr.mxu0 %v2737_v24  ;;  %v2875_v24 = vld [vmem:[%s5220_s8 + $0x798] sm:$0xff] }
 0x32f   :  { %1466 = vmatpush1.msra.mxu0 %v2736_v28  ;;  %v2874_v28 = vld [vmem:[%s5220_s8 + $0x790] sm:$0xff] }
 0x330   :  { %1467 = vmatprep.subr.mxu0 %v2735_v32  ;;  %v2873_v32 = vld [vmem:[%s5220_s8 + $0x788] sm:$0xff] }
 0x331   :  { %1468 = vmatpush1.msra.mxu0 %v2734_v36 }
 0x332   :  { %1469 = vmatprep.subr.mxu0 %v2733_v40  ;;  %v2872_v40 = vld [vmem:[%s5220_s8 + $0x780] sm:$0xff] }
 0x333   :  { %1470 = vmatpush1.msra.mxu0 %v2732_v47  ;;  %v2871_v47 = vld [vmem:[%s5220_s8 + $0x778] sm:$0xff] }
 0x334   :  { %1471 = vmatprep.subr.mxu0 %v2731_v21  ;;  %v2870_v21 = vld [vmem:[%s5220_s8 + $0x770] sm:$0xff] }
 0x335   :  { %1472 = vmatpush1.msra.mxu0 %v2730_v25  ;;  %v2805_v25 = vld [vmem:[%s5220_s8 + $0x568] sm:$0xff] }
 0x336   :  { %1473 = vmatprep.subr.mxu0 %v2729_v48 }
 0x337   :  { %1474 = vmatpush1.msra.mxu0 %v2728_v49  ;;  %v2868_v49 = vld [vmem:[%s5220_s8 + $0x760] sm:$0xff] }
 0x3b0   :  { %v3017_v31 = vpop.f32.mrf.mxu1 }
 0x3b2   :  { %v3018_v60 = vpop.f32.mrf.mxu1 }
 0x3b3   :  { %v4066_v33 = vadd.f32 %v3018_v60, %v3017_v31  ;;  %v2823_v31 = vld [vmem:[%s5220_s8 + $0x5f8] sm:$0xff] }
 0x3b4   :  { %v3020_v35 = vpop.f32.mrf.mxu1  ;;  %v2887_v60 = vld [vmem:[%s5220_s8 + $0x7f8] sm:$0xff] }
 0x3b5   :  { %1722 = vmatprep.subr.mxu0 %v2887_v60  ;;  %v2803_v60 = vld [vmem:[%s5220_s8 + $0x558] sm:$0xff] }
 0x3b6   :  { %v3021_v37 = vpop.f32.mrf.mxu1 }
 0x3b7   :  { %v4068_v57 = vadd.f32 %v3021_v37, %v3020_v35 }
 0x3b8   :  { %v3023_v39 = vpop.f32.mrf.mxu1 }
 0x3ba   :  { %v3024_v56 = vpop.f32.mrf.mxu1 }
 0x3bb   :  { %v3025_v41 = vadd.f32 %v3024_v56, %v3023_v39 }
 0x3bd   :  { %v4076_v42 = vadd.f32 %v3025_v41, %v4073_v55  ;;  %v806_v41 = vadd.f32 %v4066_v33, %v4073_v55  ;;  %v2821_v33 = vld [vmem:[%s5220_s8 + $0x5e8] sm:$0xff] }
 0x3c0   :  { %v888_v53 = vpop.f32.mrf.mxu1 }
 0x3c2   :  { %v890_v58 = vpop.f32.mrf.mxu1 }
 0x3c3   :  { %1002 = vmatprep.mubr.f32.mxu1 %v890_v58 }
 0x3c4   :  { %v894_v45 = vpop.f32.mrf.mxu1  ;;  %1003 = vmatmul.mubr.f32.vlgmr.msra.gmra.mxu1 %v888_v53 }
 0x3c5   :  { %1305 = vmatpush1.msra.mxu1 %v2694_v43 }
 0x3c6   :  { %v896_v52 = vpop.f32.mrf.mxu1  ;;  %1306 = vmatprep.subr.mxu1 %v2693_v44 }
 0x3c7   :  { %1007 = vmatprep.mubr.f32.mxu1 %v896_v52  ;;  %1307 = vmatpush1.msra.mxu1 %v2692_v50  ;;  %v2822_v52 = vld [vmem:[%s5220_s8 + $0x5f0] sm:$0xff] }
 0x3c8   :  { %v900_v62 = vpop.f32.mrf.mxu1  ;;  %1008 = vmatmul.mubr.f32.gmra.mxu1 %v894_v45  ;;  %1308 = vmatprep.subr.mxu1 %v2691_v51 }
 0x3c9   :  { %1309 = vmatpush1.msra.mxu1 %v2690_v59  ;;  %v2886_v59 = vld [vmem:[%s5220_s8 + $0x7f0] sm:$0xff] }
 0x3ca   :  { %v902_v1 = vpop.f32.mrf.mxu1  ;;  %1310 = vmatprep.subr.mxu1 %v2689_v61  ;;  %v2885_v61 = vld [vmem:[%s5220_s8 + $0x7e8] sm:$0xff] }
 0x3cb   :  { %1012 = vmatprep.mubr.f32.mxu1 %v902_v1  ;;  %1311 = vmatpush1.msra.mxu1 %v2688_v63  ;;  %v2884_v63 = vld [vmem:[%s5220_s8 + $0x7e0] sm:$0xff]  ;;  %v2883_v1 = vld [vmem:[%s5220_s8 + $0x7d8] sm:$0xff] }
 0x3cc   :  { %1013 = vmatmul.mubr.f32.gmra.mxu1 %v900_v62  ;;  %1312 = vmatprep.subr.mxu1 %v2687_v0  ;;  %v2820_v62 = vld [vmem:[%s5220_s8 + $0x5e0] sm:$0xff]  ;;  %v2819_v0 = vld [vmem:[%s5220_s8 + $0x5d8] sm:$0xff] }
 0x3cd   :  { %1313 = vmatpush1.msra.mxu1 %v2686_v3  ;;  %1368 = vmatprep.mubr.f32.mxu1 %v3171_v54  ;;  %v2818_v3 = vld [vmem:[%s5220_s8 + $0x5d0] sm:$0xff] }
 0x3ce   :  { %1314 = vmatprep.subr.mxu1 %v2685_v4  ;;  %v2882_v4 = vld [vmem:[%s5220_s8 + $0x7d0] sm:$0xff] }
 0x3cf   :  { %1315 = vmatpush1.msra.mxu1 %v2684_v6  ;;  %v2817_v6 = vld [vmem:[%s5220_s8 + $0x5c8] sm:$0xff] }
 0x3d0   :  { %1316 = vmatprep.subr.mxu1 %v2683_v7  ;;  %v2881_v7 = vld [vmem:[%s5220_s8 + $0x7c8] sm:$0xff] }
 0x3d1   :  { %1317 = vmatpush1.msra.mxu1 %v2682_v9  ;;  %v2816_v9 = vld [vmem:[%s5220_s8 + $0x5c0] sm:$0xff] }
 0x3d2   :  { %1318 = vmatprep.subr.mxu1 %v2681_v10  ;;  %v3099_v35 = vpop.f32.mrf.mxu0  ;;  %v2880_v10 = vld [vmem:[%s5220_s8 + $0x7c0] sm:$0xff] }
 0x3d3   :  { %1319 = vmatpush1.msra.mxu1 %v2680_v11  ;;  %v2815_v11 = vld [vmem:[%s5220_s8 + $0x5b8] sm:$0xff] }
 0x3d4   :  { %1320 = vmatprep.subr.mxu1 %v2679_v12  ;;  %v3100_v56 = vpop.f32.mrf.mxu0  ;;  %v2879_v12 = vld [vmem:[%s5220_s8 + $0x7b8] sm:$0xff] }
 0x3d5   :  { %1321 = vmatpush1.msra.mxu1 %v2678_v13  ;;  %v3101_v43 = vadd.f32 %v3100_v56, %v3099_v35  ;;  %v2814_v13 = vld [vmem:[%s5220_s8 + $0x5b0] sm:$0xff]  ;;  %v2867_v35 = vld [vmem:[%s5220_s8 + $0x758] sm:$0xff]  ;;  %v2801_v56 = vld [vmem:[%s5220_s8 + $0x548] sm:$0xff] }
 0x3d6   :  { %1322 = vmatprep.subr.mxu1 %v2677_v14  ;;  %v2878_v14 = vld [vmem:[%s5220_s8 + $0x7b0] sm:$0xff]  ;;  %v3102_v36 = vpop.f32.mrf.mxu0 }
 0x3d7   :  { %1323 = vmatpush1.msra.mxu1 %v2676_v15  ;;  %v2813_v15 = vld [vmem:[%s5220_s8 + $0x5a8] sm:$0xff] }
 0x3d8   :  { %1324 = vmatprep.subr.mxu1 %v2675_v16  ;;  %v2877_v16 = vld [vmem:[%s5220_s8 + $0x7a8] sm:$0xff]  ;;  %v3103_v48 = vpop.f32.mrf.mxu0 }
 0x3d9   :  { %1325 = vmatpush1.msra.mxu1 %v2674_v18  ;;  %v2812_v18 = vld [vmem:[%s5220_s8 + $0x5a0] sm:$0xff] }
 0x3da   :  { %1326 = vmatprep.subr.mxu1 %v2673_v22  ;;  %v2811_v22 = vld [vmem:[%s5220_s8 + $0x598] sm:$0xff] }
 0x3db   :  { %1327 = vmatpush1.msra.mxu1 %v2672_v26  ;;  %v2810_v26 = vld [vmem:[%s5220_s8 + $0x590] sm:$0xff] }
 0x3dc   :  { %1328 = vmatprep.subr.mxu1 %v2671_v30  ;;  %v2809_v30 = vld [vmem:[%s5220_s8 + $0x588] sm:$0xff] }
 0x3dd   :  { %1329 = vmatpush1.msra.mxu1 %v2670_v34 }
 0x3de   :  { %1330 = vmatprep.subr.mxu1 %v2669_v38  ;;  %v2808_v38 = vld [vmem:[%s5220_s8 + $0x580] sm:$0xff] }
 0x3df   :  { %1331 = vmatpush1.msra.mxu1 %v2668_v46  ;;  %v2807_v46 = vld [vmem:[%s5220_s8 + $0x578] sm:$0xff] }
 0x3e0   :  { %1332 = vmatprep.subr.mxu1 %v2667_v19  ;;  %v2806_v19 = vld [vmem:[%s5220_s8 + $0x570] sm:$0xff] }
 0x3e1   :  { %1333 = vmatpush1.msra.mxu1 %v2666_v23 }
 0x3e2   :  { %1334 = vmatprep.subr.mxu1 %v2665_v27  ;;  %v2869_v27 = vld [vmem:[%s5220_s8 + $0x768] sm:$0xff] }
 0x3e3   :  { %1335 = vmatpush1.msra.mxu1 %v2664_v29  ;;  %v2804_v29 = vld [vmem:[%s5220_s8 + $0x560] sm:$0xff] }
 0x3e4   :  { %1583 = vmatprep.subr.mxu1 %v2823_v31  ;;  %v807_v31 = vadd.f32 %v4068_v57, %v4073_v55  ;;  %v2866_v57 = vld [vmem:[%s5220_s8 + $0x750] sm:$0xff] }
 0x484   :  { %v3058_v37 = vpop.f32.mrf.mxu1 }
 0x486   :  { %v3059_v39 = vpop.f32.mrf.mxu1 }
 0x487   :  { %v3060_v53 = vadd.f32 %v3059_v39, %v3058_v37  ;;  %v2802_v37 = vld [vmem:[%s5220_s8 + $0x550] sm:$0xff]  ;;  %v3104_v39 = vadd.f32 %v3103_v48, %v3102_v36  ;;  %v2944_v36 = vld [vmem:[%s5220_s8 + $0x9c0] sm:$0xff] }
 0x488   :  { %v3061_v17 = vpop.f32.mrf.mxu1  ;;  %v2972_v48 = vld [vmem:[%s5220_s8 + $0xaa0] sm:$0xff] }
 0x489   :  { %v1018_v58 = vadd.f32 %v3060_v53, %v806_v41  ;;  %v2865_v41 = vld [vmem:[%s5220_s8 + $0x748] sm:$0xff]  ;;  %v2800_v53 = vld [vmem:[%s5220_s8 + $0x540] sm:$0xff] }
 0x48a   :  { %v3062_v34 = vpop.f32.mrf.mxu1 }
 0x48b   :  { %v1230_v44 = vadd.f32 %v3101_v43, %v1018_v58  ;;  %v3063_v23 = vadd.f32 %v3062_v34, %v3061_v17  ;;  %v2864_v58 = vld [vmem:[%s5220_s8 + $0x740] sm:$0xff]  ;;  %v2799_v43 = vld [vmem:[%s5220_s8 + $0x538] sm:$0xff]  ;;  %v2949_v17 = vld [vmem:[%s5220_s8 + $0x9e8] sm:$0xff] }
 0x48c   :  { %v2977_v34 = vld [vmem:[%s5220_s8 + $0xac8] sm:$0xff] }
 0x48d   :  { %v4216_v45 = vmax.f32 %v1230_v44, 0.0  ;;  %v1019_v55 = vadd.f32 %v3063_v23, %v807_v31  ;;  %v2863_v44 = vld [vmem:[%s5220_s8 + $0x738] sm:$0xff]  ;;  %v2973_v23 = vld [vmem:[%s5220_s8 + $0xaa8] sm:$0xff]  ;;  %v2938_v31 = vld [vmem:[%s5220_s8 + $0x990] sm:$0xff] }
 0x48f   :  { %v1302_v50 = vrot.slane %v4216_v45, 2  ;;  %v1441_v51 = vrot.slane %v4216_v45, 6 }
 0x491   :  { %1369 = vmatmul.mubr.f32.vlgmr.msra.gmra.mxu1 %v1302_v50  ;;  %1508 = vmatmul.mubr.f32.vlgmr.msra.gmra.mxu0 %v1441_v51  ;;  %v2798_v50 = vld [vmem:[%s5220_s8 + $0x530] sm:$0xff] }
 0x492   :  { %1584 = vmatpush1.msra.mxu1 %v2822_v52  ;;  %1723 = vmatpush1.msra.mxu0 %v2886_v59  ;;  %v2862_v51 = vld [vmem:[%s5220_s8 + $0x730] sm:$0xff]  ;;  %v1231_v52 = vadd.f32 %v3104_v39, %v1019_v55  ;;  %v2797_v59 = vld [vmem:[%s5220_s8 + $0x528] sm:$0xff]  ;;  %v3105_v55 = vpop.f32.mrf.mxu0  ;;  %v2936_v39 = vld [vmem:[%s5220_s8 + $0x980] sm:$0xff] }
 0x493   :  { %1585 = vmatprep.subr.mxu1 %v2821_v33  ;;  %1724 = vmatprep.subr.mxu0 %v2885_v61  ;;  %v2861_v33 = vld [vmem:[%s5220_s8 + $0x728] sm:$0xff]  ;;  %v2796_v61 = vld [vmem:[%s5220_s8 + $0x520] sm:$0xff] }
 0x494   :  { %1586 = vmatpush1.msra.mxu1 %v2820_v62  ;;  %1725 = vmatpush1.msra.mxu0 %v2884_v63  ;;  %v2860_v62 = vld [vmem:[%s5220_s8 + $0x720] sm:$0xff]  ;;  %v2795_v63 = vld [vmem:[%s5220_s8 + $0x518] sm:$0xff] }
 0x495   :  { %1587 = vmatprep.subr.mxu1 %v2819_v0  ;;  %1726 = vmatprep.subr.mxu0 %v2883_v1  ;;  %v2859_v0 = vld [vmem:[%s5220_s8 + $0x718] sm:$0xff]  ;;  %v2794_v1 = vld [vmem:[%s5220_s8 + $0x510] sm:$0xff] }
 0x496   :  { %1588 = vmatpush1.msra.mxu1 %v2818_v3  ;;  %1727 = vmatpush1.msra.mxu0 %v2882_v4  ;;  %v2858_v3 = vld [vmem:[%s5220_s8 + $0x710] sm:$0xff]  ;;  %v4396_v4 = vmax.f32 %v1231_v52, 0.0  ;;  %v3106_v52 = vpop.f32.mrf.mxu0 }
 0x497   :  { %1589 = vmatprep.subr.mxu1 %v2817_v6  ;;  %1728 = vmatprep.subr.mxu0 %v2881_v7  ;;  %v2793_v6 = vld [vmem:[%s5220_s8 + $0x508] sm:$0xff] }
 0x498   :  { %1590 = vmatpush1.msra.mxu1 %v2816_v9  ;;  %1729 = vmatpush1.msra.mxu0 %v2880_v10  ;;  %v2857_v7 = vld [vmem:[%s5220_s8 + $0x708] sm:$0xff]  ;;  %v2792_v9 = vld [vmem:[%s5220_s8 + $0x500] sm:$0xff] }
 0x499   :  { %1591 = vmatprep.subr.mxu1 %v2815_v11  ;;  %1730 = vmatprep.subr.mxu0 %v2879_v12  ;;  %v2856_v10 = vld [vmem:[%s5220_s8 + $0x700] sm:$0xff]  ;;  %v1581_v11 = vrot.slane %v4396_v4, 2  ;;  %v1720_v12 = vrot.slane %v4396_v4, 6 }
 0x49a   :  { %1592 = vmatpush1.msra.mxu1 %v2814_v13  ;;  %1731 = vmatpush1.msra.mxu0 %v2878_v14  ;;  %v2951_v13 = vld [vmem:[%s5220_s8 + $0x9f8] sm:$0xff] }
 0x49b   :  { %1593 = vmatprep.subr.mxu1 %v2813_v15  ;;  %1732 = vmatprep.subr.mxu0 %v2877_v16  ;;  %v2983_v14 = vld [vmem:[%s5220_s8 + $0xaf8] sm:$0xff]  ;;  %v2950_v15 = vld [vmem:[%s5220_s8 + $0x9f0] sm:$0xff] }
 0x49c   :  { %1594 = vmatpush1.msra.mxu1 %v2812_v18  ;;  %1733 = vmatpush1.msra.mxu0 %v2876_v20  ;;  %v2982_v16 = vld [vmem:[%s5220_s8 + $0xaf0] sm:$0xff]  ;;  %v2981_v18 = vld [vmem:[%s5220_s8 + $0xae8] sm:$0xff]  ;;  %v2948_v20 = vld [vmem:[%s5220_s8 + $0x9e0] sm:$0xff] }
 0x49d   :  { %1595 = vmatprep.subr.mxu1 %v2811_v22  ;;  %1734 = vmatprep.subr.mxu0 %v2875_v24  ;;  %v2980_v22 = vld [vmem:[%s5220_s8 + $0xae0] sm:$0xff]  ;;  %v2947_v24 = vld [vmem:[%s5220_s8 + $0x9d8] sm:$0xff] }
 0x49e   :  { %1596 = vmatpush1.msra.mxu1 %v2810_v26  ;;  %1735 = vmatpush1.msra.mxu0 %v2874_v28  ;;  %v2979_v26 = vld [vmem:[%s5220_s8 + $0xad8] sm:$0xff]  ;;  %v2946_v28 = vld [vmem:[%s5220_s8 + $0x9d0] sm:$0xff] }
 0x49f   :  { %1597 = vmatprep.subr.mxu1 %v2809_v30  ;;  %1736 = vmatprep.subr.mxu0 %v2873_v32  ;;  %v2978_v30 = vld [vmem:[%s5220_s8 + $0xad0] sm:$0xff]  ;;  %v2945_v32 = vld [vmem:[%s5220_s8 + $0x9c8] sm:$0xff] }
 0x4a0   :  { %1598 = vmatpush1.msra.mxu1 %v2808_v38  ;;  %1737 = vmatpush1.msra.mxu0 %v2872_v40  ;;  %v2976_v38 = vld [vmem:[%s5220_s8 + $0xac0] sm:$0xff]  ;;  %v2943_v40 = vld [vmem:[%s5220_s8 + $0x9b8] sm:$0xff] }
 0x4a1   :  { %1599 = vmatprep.subr.mxu1 %v2807_v46  ;;  %1738 = vmatprep.subr.mxu0 %v2871_v47  ;;  %v2975_v46 = vld [vmem:[%s5220_s8 + $0xab8] sm:$0xff]  ;;  %v2942_v47 = vld [vmem:[%s5220_s8 + $0x9b0] sm:$0xff] }
 0x4a2   :  { %1600 = vmatpush1.msra.mxu1 %v2806_v19  ;;  %1739 = vmatpush1.msra.mxu0 %v2870_v21  ;;  %v2974_v19 = vld [vmem:[%s5220_s8 + $0xab0] sm:$0xff]  ;;  %v2941_v21 = vld [vmem:[%s5220_s8 + $0x9a8] sm:$0xff] }
 0x4a3   :  { %1601 = vmatprep.subr.mxu1 %v2805_v25  ;;  %1740 = vmatprep.subr.mxu0 %v2869_v27  ;;  %v3064_v25 = vpop.f32.mrf.mxu1  ;;  %v2940_v27 = vld [vmem:[%s5220_s8 + $0x9a0] sm:$0xff] }
 0x4a4   :  { %1602 = vmatpush1.msra.mxu1 %v2804_v29  ;;  %1741 = vmatpush1.msra.mxu0 %v2868_v49  ;;  %v2939_v29 = vld [vmem:[%s5220_s8 + $0x998] sm:$0xff] }
 0x4a5   :  { %1603 = vmatprep.subr.mxu1 %v2803_v60  ;;  %1742 = vmatprep.subr.mxu0 %v2867_v35  ;;  %v2971_v49 = vld [vmem:[%s5220_s8 + $0xa98] sm:$0xff]  ;;  %v2970_v60 = vld [vmem:[%s5220_s8 + $0xa90] sm:$0xff]  ;;  %v2937_v35 = vld [vmem:[%s5220_s8 + $0x988] sm:$0xff] }
 0x4a6   :  { %1604 = vmatpush1.msra.mxu1 %v2802_v37  ;;  %1743 = vmatpush1.msra.mxu0 %v2866_v57  ;;  %v2969_v37 = vld [vmem:[%s5220_s8 + $0xa88] sm:$0xff]  ;;  %v3065_v57 = vpop.f32.mrf.mxu1 }
 0x4a7   :  { %1605 = vmatprep.subr.mxu1 %v2801_v56  ;;  %1744 = vmatprep.subr.mxu0 %v2865_v41  ;;  %v2968_v56 = vld [vmem:[%s5220_s8 + $0xa80] sm:$0xff]  ;;  %v2935_v41 = vld [vmem:[%s5220_s8 + $0x978] sm:$0xff] }
 0x4a8   :  { %1606 = vmatpush1.msra.mxu1 %v2800_v53  ;;  %1745 = vmatpush1.msra.mxu0 %v2864_v58  ;;  %v2967_v53 = vld [vmem:[%s5220_s8 + $0xa78] sm:$0xff]  ;;  %v2934_v58 = vld [vmem:[%s5220_s8 + $0x970] sm:$0xff] }
 0x4a9   :  { %1607 = vmatprep.subr.mxu1 %v2799_v43  ;;  %1746 = vmatprep.subr.mxu0 %v2863_v44  ;;  %v2966_v43 = vld [vmem:[%s5220_s8 + $0xa70] sm:$0xff]  ;;  %v3066_v44 = vadd.f32 %v3065_v57, %v3064_v25  ;;  %v2725_v25 = vld [vmem:[%s5220_s8 + $0x2e8] sm:$0xff]  ;;  %v1260_v57 = vld [vmem:[%s5220_s8 + $0xc0] sm:$0xff] }
 0x4aa   :  { %1608 = vmatpush1.msra.mxu1 %v2798_v50  ;;  %1747 = vmatpush1.msra.mxu0 %v2862_v51  ;;  %v2933_v50 = vld [vmem:[%s5220_s8 + $0x968] sm:$0xff] }
 0x4ab   :  { %1609 = vmatprep.subr.mxu1 %v2797_v59  ;;  %1748 = vmatprep.subr.mxu0 %v2861_v33  ;;  %v2965_v51 = vld [vmem:[%s5220_s8 + $0xa68] sm:$0xff]  ;;  %v2932_v59 = vld [vmem:[%s5220_s8 + $0x960] sm:$0xff] }
 0x4ac   :  { %1610 = vmatpush1.msra.mxu1 %v2796_v61  ;;  %1749 = vmatpush1.msra.mxu0 %v2860_v62  ;;  %v2964_v33 = vld [vmem:[%s5220_s8 + $0xa60] sm:$0xff]  ;;  %v2931_v61 = vld [vmem:[%s5220_s8 + $0x958] sm:$0xff] }
 0x4ad   :  { %1611 = vmatprep.subr.mxu1 %v2795_v63  ;;  %1750 = vmatprep.subr.mxu0 %v2859_v0  ;;  %v2963_v62 = vld [vmem:[%s5220_s8 + $0xa58] sm:$0xff]  ;;  %v2930_v63 = vld [vmem:[%s5220_s8 + $0x950] sm:$0xff] }
 0x4ae   :  { %1612 = vmatpush1.msra.mxu1 %v2794_v1  ;;  %1751 = vmatpush1.msra.mxu0 %v2858_v3  ;;  %v2962_v0 = vld [vmem:[%s5220_s8 + $0xa50] sm:$0xff]  ;;  %v1020_v1 = vadd.f32 %v3066_v44, %v4076_v42  ;;  %v3107_v3 = vadd.f32 %v3106_v52, %v3105_v55  ;;  %v2960_v42 = vld [vmem:[%s5220_s8 + $0xa40] sm:$0xff]  ;;  %v2715_v52 = vld [vmem:[%s5220_s8 + $0x298] sm:$0xff] }
 0x4af   :  { %1613 = vmatprep.subr.mxu1 %v2793_v6  ;;  %1752 = vmatprep.subr.mxu0 %v2857_v7  ;;  %v2929_v6 = vld [vmem:[%s5220_s8 + $0x948] sm:$0xff]  ;;  %v2720_v55 = vld [vmem:[%s5220_s8 + $0x2c0] sm:$0xff] }
 0x4b0   :  { %1614 = vmatpush1.msra.mxu1 %v2792_v9  ;;  %1647 = vmatprep.mubr.f32.mxu1 %v3171_v54  ;;  %v2961_v7 = vld [vmem:[%s5220_s8 + $0xa48] sm:$0xff]  ;;  %v2928_v9 = vld [vmem:[%s5220_s8 + $0x940] sm:$0xff] }
 0x4b1   :  { %1753 = vmatpush1.msra.mxu0 %v2856_v10  ;;  %1786 = vmatprep.mubr.f32.mxu0 %v3171_v54  ;;  %v2927_v10 = vld [vmem:[%s5220_s8 + $0x938] sm:$0xff]  ;;  %v1256_v44 = vld [vmem:[%s5220_s8 + $0xa0] sm:$0xff] }
 0x4b2   :  { %1648 = vmatmul.mubr.f32.vlgmr.msra.gmra.mxu1 %v1581_v11  ;;  %1787 = vmatmul.mubr.f32.vlgmr.msra.gmra.mxu0 %v1720_v12  ;;  %v2959_v11 = vld [vmem:[%s5220_s8 + $0xa38] sm:$0xff]  ;;  %v2926_v12 = vld [vmem:[%s5220_s8 + $0x930] sm:$0xff] }
 0x4b3   :  { %1862 = vmatprep.subr.mxu1 %v2951_v13  ;;  %1968 = vmatprep.subr.mxu0 %v2983_v14  ;;  %v2958_v13 = vld [vmem:[%s5220_s8 + $0xa30] sm:$0xff]  ;;  %v1232_v14 = vadd.f32 %v3107_v3, %v1020_v1  ;;  %v1251_v1 = vld [vmem:[%s5220_s8 + $0x78] sm:$0xff] }
 0x4b4   :  { %1863 = vmatpush1.msra.mxu1 %v2950_v15  ;;  %1969 = vmatpush1.msra.mxu0 %v2982_v16  ;;  %v2925_v15 = vld [vmem:[%s5220_s8 + $0x928] sm:$0xff]  ;;  %v2711_v3 = vld [vmem:[%s5220_s8 + $0x278] sm:$0xff] }
 0x4b5   :  { %1864 = vmatprep.subr.mxu1 %v2949_v17  ;;  %1970 = vmatprep.subr.mxu0 %v2981_v18  ;;  %v2957_v16 = vld [vmem:[%s5220_s8 + $0xa28] sm:$0xff]  ;;  %v2924_v17 = vld [vmem:[%s5220_s8 + $0x920] sm:$0xff] }
 0x4b6   :  { %1865 = vmatpush1.msra.mxu1 %v2948_v20  ;;  %1971 = vmatpush1.msra.mxu0 %v2980_v22  ;;  %v2956_v18 = vld [vmem:[%s5220_s8 + $0xa20] sm:$0xff]  ;;  %v2923_v20 = vld [vmem:[%s5220_s8 + $0x918] sm:$0xff] }
 0x4b7   :  { %1866 = vmatprep.subr.mxu1 %v2947_v24  ;;  %1972 = vmatprep.subr.mxu0 %v2979_v26  ;;  %v2955_v22 = vld [vmem:[%s5220_s8 + $0xa18] sm:$0xff]  ;;  %v2922_v24 = vld [vmem:[%s5220_s8 + $0x910] sm:$0xff] }
 0x4b8   :  { %1867 = vmatpush1.msra.mxu1 %v2946_v28  ;;  %1973 = vmatpush1.msra.mxu0 %v2978_v30  ;;  %v2954_v26 = vld [vmem:[%s5220_s8 + $0xa10] sm:$0xff]  ;;  %v4595_v28 = vmax.f32 %v1232_v14, 0.0  ;;  %v2921_v30 = vld [vmem:[%s5220_s8 + $0x908] sm:$0xff] }
 0x4b9   :  { %1868 = vmatprep.subr.mxu1 %v2945_v32  ;;  %1974 = vmatprep.subr.mxu0 %v2977_v34  ;;  %v2953_v32 = vld [vmem:[%s5220_s8 + $0xa08] sm:$0xff]  ;;  %v2920_v34 = vld [vmem:[%s5220_s8 + $0x900] sm:$0xff]  ;;  %v1246_v14 = vld [vmem:[%s5220_s8 + $0x50] sm:$0xff] }
 0x4ba   :  { %1869 = vmatpush1.msra.mxu1 %v2944_v36  ;;  %1975 = vmatpush1.msra.mxu0 %v2976_v38  ;;  %v2952_v36 = vld [vmem:[%s5220_s8 + $0xa00] sm:$0xff]  ;;  %v1860_v38 = vrot.slane %v4595_v28, 2 }
 0x4bb   :  { %1870 = vmatprep.subr.mxu1 %v2943_v40  ;;  %1976 = vmatprep.subr.mxu0 %v2975_v46  ;;  %v1966_v40 = vrot.slane %v4595_v28, 4  ;;  %v1267_v46 = vld [vmem:[%s5220_s8 + $0xf8] sm:$0xff] }
 0x4bc   :  { %1871 = vmatpush1.msra.mxu1 %v2942_v47  ;;  %1977 = vmatpush1.msra.mxu0 %v2974_v19  ;;  %v2727_v47 = vld [vmem:[%s5220_s8 + $0x2f8] sm:$0xff]  ;;  %v1266_v19 = vld [vmem:[%s5220_s8 + $0xf0] sm:$0xff] }
 0x4bd   :  { %1872 = vmatprep.subr.mxu1 %v2941_v21  ;;  %1978 = vmatprep.subr.mxu0 %v2973_v23  ;;  %v2726_v21 = vld [vmem:[%s5220_s8 + $0x2f0] sm:$0xff]  ;;  %v1265_v23 = vld [vmem:[%s5220_s8 + $0xe8] sm:$0xff] }
 0x4be   :  { %1873 = vmatpush1.msra.mxu1 %v2940_v27  ;;  %1979 = vmatpush1.msra.mxu0 %v2972_v48  ;;  %v1264_v27 = vld [vmem:[%s5220_s8 + $0xe0] sm:$0xff] }
 0x4bf   :  { %1874 = vmatprep.subr.mxu1 %v2939_v29  ;;  %1980 = vmatprep.subr.mxu0 %v2971_v49  ;;  %v2724_v48 = vld [vmem:[%s5220_s8 + $0x2e0] sm:$0xff]  ;;  %v1263_v29 = vld [vmem:[%s5220_s8 + $0xd8] sm:$0xff] }
 0x4c0   :  { %1875 = vmatpush1.msra.mxu1 %v2938_v31  ;;  %1981 = vmatpush1.msra.mxu0 %v2970_v60  ;;  %v2723_v49 = vld [vmem:[%s5220_s8 + $0x2d8] sm:$0xff]  ;;  %v1262_v31 = vld [vmem:[%s5220_s8 + $0xd0] sm:$0xff] }
 0x4c1   :  { %1876 = vmatprep.subr.mxu1 %v2937_v35  ;;  %1982 = vmatprep.subr.mxu0 %v2969_v37  ;;  %v2722_v60 = vld [vmem:[%s5220_s8 + $0x2d0] sm:$0xff]  ;;  %v1261_v35 = vld [vmem:[%s5220_s8 + $0xc8] sm:$0xff] }
 0x4c2   :  { %1877 = vmatpush1.msra.mxu1 %v2936_v39  ;;  %1983 = vmatpush1.msra.mxu0 %v2968_v56  ;;  %v2721_v37 = vld [vmem:[%s5220_s8 + $0x2c8] sm:$0xff]  ;;  %v1259_v39 = vld [vmem:[%s5220_s8 + $0xb8] sm:$0xff] }
 0x4c3   :  { %1878 = vmatprep.subr.mxu1 %v2935_v41  ;;  %1984 = vmatprep.subr.mxu0 %v2967_v53  ;;  %v2719_v56 = vld [vmem:[%s5220_s8 + $0x2b8] sm:$0xff]  ;;  %v1258_v41 = vld [vmem:[%s5220_s8 + $0xb0] sm:$0xff] }
 0x4c4   :  { %1879 = vmatpush1.msra.mxu1 %v2934_v58  ;;  %1985 = vmatpush1.msra.mxu0 %v2966_v43  ;;  %v2718_v53 = vld [vmem:[%s5220_s8 + $0x2b0] sm:$0xff]  ;;  %v1257_v58 = vld [vmem:[%s5220_s8 + $0xa8] sm:$0xff] }
 0x4c5   :  { %1880 = vmatprep.subr.mxu1 %v2933_v50  ;;  %1986 = vmatprep.subr.mxu0 %v2965_v51  ;;  %v2717_v43 = vld [vmem:[%s5220_s8 + $0x2a8] sm:$0xff]  ;;  %v2716_v50 = vld [vmem:[%s5220_s8 + $0x2a0] sm:$0xff]  ;;  %v1255_v51 = vld [vmem:[%s5220_s8 + $0x98] sm:$0xff] }
 0x4c6   :  { %1881 = vmatpush1.msra.mxu1 %v2932_v59  ;;  %1987 = vmatpush1.msra.mxu0 %v2964_v33  ;;  %v1254_v59 = vld [vmem:[%s5220_s8 + $0x90] sm:$0xff] }
 0x4c7   :  { %1882 = vmatprep.subr.mxu1 %v2931_v61  ;;  %1988 = vmatprep.subr.mxu0 %v2963_v62  ;;  %v2714_v33 = vld [vmem:[%s5220_s8 + $0x290] sm:$0xff]  ;;  %v1253_v61 = vld [vmem:[%s5220_s8 + $0x88] sm:$0xff] }
 0x4c8   :  { %1883 = vmatpush1.msra.mxu1 %v2930_v63  ;;  %1989 = vmatpush1.msra.mxu0 %v2962_v0  ;;  %v2713_v62 = vld [vmem:[%s5220_s8 + $0x288] sm:$0xff]  ;;  %v1252_v63 = vld [vmem:[%s5220_s8 + $0x80] sm:$0xff] }
 0x4c9   :  { %1884 = vmatprep.subr.mxu1 %v2929_v6  ;;  %1990 = vmatprep.subr.mxu0 %v2961_v7  ;;  %v2712_v0 = vld [vmem:[%s5220_s8 + $0x280] sm:$0xff]  ;;  %v1250_v6 = vld [vmem:[%s5220_s8 + $0x70] sm:$0xff] }
 0x4ca   :  { %1885 = vmatpush1.msra.mxu1 %v2928_v9  ;;  %1991 = vmatpush1.msra.mxu0 %v2960_v42  ;;  %v2710_v7 = vld [vmem:[%s5220_s8 + $0x270] sm:$0xff]  ;;  %v1249_v9 = vld [vmem:[%s5220_s8 + $0x68] sm:$0xff] }
 0x4cb   :  { %1886 = vmatprep.subr.mxu1 %v2927_v10  ;;  %1992 = vmatprep.subr.mxu0 %v2959_v11  ;;  %v2709_v42 = vld [vmem:[%s5220_s8 + $0x268] sm:$0xff]  ;;  %v1248_v10 = vld [vmem:[%s5220_s8 + $0x60] sm:$0xff] }
 0x4cc   :  { %1887 = vmatpush1.msra.mxu1 %v2926_v12  ;;  %1993 = vmatpush1.msra.mxu0 %v2958_v13  ;;  %v2708_v11 = vld [vmem:[%s5220_s8 + $0x260] sm:$0xff]  ;;  %v1247_v12 = vld [vmem:[%s5220_s8 + $0x58] sm:$0xff] }
 0x4cd   :  { %1888 = vmatprep.subr.mxu1 %v2925_v15  ;;  %1994 = vmatprep.subr.mxu0 %v2957_v16  ;;  %v2707_v13 = vld [vmem:[%s5220_s8 + $0x258] sm:$0xff]  ;;  %v2706_v15 = vld [vmem:[%s5220_s8 + $0x250] sm:$0xff]  ;;  %v1245_v16 = vld [vmem:[%s5220_s8 + $0x48] sm:$0xff] }
 0x4ce   :  { %1889 = vmatpush1.msra.mxu1 %v2924_v17  ;;  %1995 = vmatpush1.msra.mxu0 %v2956_v18  ;;  %v2705_v17 = vld [vmem:[%s5220_s8 + $0x248] sm:$0xff]  ;;  %v1244_v18 = vld [vmem:[%s5220_s8 + $0x40] sm:$0xff] }
 0x4cf   :  { %1890 = vmatprep.subr.mxu1 %v2923_v20  ;;  %1996 = vmatprep.subr.mxu0 %v2955_v22  ;;  %v2704_v20 = vld [vmem:[%s5220_s8 + $0x240] sm:$0xff]  ;;  %v1243_v22 = vld [vmem:[%s5220_s8 + $0x38] sm:$0xff] }
 0x4d0   :  { %1891 = vmatpush1.msra.mxu1 %v2922_v24  ;;  %1997 = vmatpush1.msra.mxu0 %v2954_v26  ;;  %v2703_v24 = vld [vmem:[%s5220_s8 + $0x238] sm:$0xff]  ;;  %v1242_v26 = vld [vmem:[%s5220_s8 + $0x30] sm:$0xff] }
 0x4d1   :  { %1892 = vmatprep.subr.mxu1 %v2921_v30  ;;  %1998 = vmatprep.subr.mxu0 %v2953_v32  ;;  %v2702_v30 = vld [vmem:[%s5220_s8 + $0x230] sm:$0xff]  ;;  %v1241_v32 = vld [vmem:[%s5220_s8 + $0x28] sm:$0xff] }
 0x4d2   :  { %1893 = vmatpush1.msra.mxu1 %v2920_v34  ;;  %1926 = vmatprep.mubr.f32.mxu1 %v3171_v54  ;;  %v2701_v34 = vld [vmem:[%s5220_s8 + $0x228] sm:$0xff] }
 0x4d3   :  { %1999 = vmatpush1.msra.mxu0 %v2952_v36  ;;  %2032 = vmatprep.mubr.f32.mxu0 %v3171_v54  ;;  %v1240_v36 = vld [vmem:[%s5220_s8 + $0x20] sm:$0xff] }
 0x4d4   :  { %1927 = vmatmul.mubr.f32.vlgmr.msra.gmra.mxu1 %v1860_v38  ;;  %2033 = vmatmul.mubr.f32.vlgmr.msra.gmra.mxu0 %v1966_v40  ;;  %v2700_v38 = vld [vmem:[%s5220_s8 + $0x220] sm:$0xff]  ;;  %v1239_v40 = vld [vmem:[%s5220_s8 + $0x18] sm:$0xff] }
 0x4d5   :  { %2039 = vmatprep.subr.mxu1 %v1267_v46  ;;  %2112 = vmatprep.subr.mxu0 %v2727_v47  ;;  %v2699_v46 = vld [vmem:[%s5220_s8 + $0x218] sm:$0xff]  ;;  %v1238_v47 = vld [vmem:[%s5220_s8 + $0x10] sm:$0xff] }
 0x4d6   :  { %2040 = vmatpush1.msra.mxu1 %v1266_v19  ;;  %2113 = vmatpush1.msra.mxu0 %v2726_v21  ;;  %v2698_v19 = vld [vmem:[%s5220_s8 + $0x210] sm:$0xff]  ;;  %v1237_v21 = vld [vmem:[%s5220_s8 + $0x8] sm:$0xff] }
 0x4d7   :  { %2041 = vmatprep.subr.mxu1 %v1265_v23  ;;  %2114 = vmatprep.subr.mxu0 %v2725_v25  ;;  %v2697_v23 = vld [vmem:[%s5220_s8 + $0x208] sm:$0xff]  ;;  %v1236_v25 = vld [vmem:[%s5220_s8] sm:$0xff] }
 0x4d8   :  { %2042 = vmatpush1.msra.mxu1 %v1264_v27  ;;  %2115 = vmatpush1.msra.mxu0 %v2724_v48  ;;  %v2696_v27 = vld [vmem:[%s5220_s8 + $0x200] sm:$0xff]  ;;  %v2110_v48 = vrot.slane %v4216_v45, 4 }
 0x4d9   :  { %2043 = vmatprep.subr.mxu1 %v1263_v29  ;;  %2116 = vmatprep.subr.mxu0 %v2723_v49  ;;  %v2791_v29 = vld [vmem:[%s5220_s8 + $0x4f8] sm:$0xff] }
 0x4da   :  { %2044 = vmatpush1.msra.mxu1 %v1262_v31  ;;  %2117 = vmatpush1.msra.mxu0 %v2722_v60  ;;  %v2855_v49 = vld [vmem:[%s5220_s8 + $0x6f8] sm:$0xff]  ;;  %v2790_v31 = vld [vmem:[%s5220_s8 + $0x4f0] sm:$0xff] }
 0x4db   :  { %2045 = vmatprep.subr.mxu1 %v1261_v35  ;;  %2118 = vmatprep.subr.mxu0 %v2721_v37  ;;  %v2854_v60 = vld [vmem:[%s5220_s8 + $0x6f0] sm:$0xff]  ;;  %v2789_v35 = vld [vmem:[%s5220_s8 + $0x4e8] sm:$0xff] }
 0x4dc   :  { %2046 = vmatpush1.msra.mxu1 %v1260_v57  ;;  %2119 = vmatpush1.msra.mxu0 %v2720_v55  ;;  %v2853_v37 = vld [vmem:[%s5220_s8 + $0x6e8] sm:$0xff]  ;;  %v2788_v57 = vld [vmem:[%s5220_s8 + $0x4e0] sm:$0xff] }
 0x4dd   :  { %2047 = vmatprep.subr.mxu1 %v1259_v39  ;;  %2120 = vmatprep.subr.mxu0 %v2719_v56  ;;  %v2852_v55 = vld [vmem:[%s5220_s8 + $0x6e0] sm:$0xff]  ;;  %v2851_v39 = vld [vmem:[%s5220_s8 + $0x6d8] sm:$0xff]  ;;  %v2786_v56 = vld [vmem:[%s5220_s8 + $0x4d0] sm:$0xff] }
 0x4de   :  { %2048 = vmatpush1.msra.mxu1 %v1258_v41  ;;  %2121 = vmatpush1.msra.mxu0 %v2718_v53  ;;  %v2850_v41 = vld [vmem:[%s5220_s8 + $0x6d0] sm:$0xff]  ;;  %v2785_v53 = vld [vmem:[%s5220_s8 + $0x4c8] sm:$0xff] }
 0x4df   :  { %2049 = vmatprep.subr.mxu1 %v1257_v58  ;;  %2122 = vmatprep.subr.mxu0 %v2717_v43  ;;  %v2849_v58 = vld [vmem:[%s5220_s8 + $0x6c8] sm:$0xff]  ;;  %v2784_v43 = vld [vmem:[%s5220_s8 + $0x4c0] sm:$0xff] }
 0x4e0   :  { %2050 = vmatpush1.msra.mxu1 %v1256_v44  ;;  %2123 = vmatpush1.msra.mxu0 %v2716_v50  ;;  %v2848_v44 = vld [vmem:[%s5220_s8 + $0x6c0] sm:$0xff]  ;;  %v2783_v50 = vld [vmem:[%s5220_s8 + $0x4b8] sm:$0xff] }
 0x4e1   :  { %2051 = vmatprep.subr.mxu1 %v1255_v51  ;;  %2124 = vmatprep.subr.mxu0 %v2715_v52  ;;  %v2847_v51 = vld [vmem:[%s5220_s8 + $0x6b8] sm:$0xff]  ;;  %v2782_v52 = vld [vmem:[%s5220_s8 + $0x4b0] sm:$0xff] }
 0x4e2   :  { %2052 = vmatpush1.msra.mxu1 %v1254_v59  ;;  %2125 = vmatpush1.msra.mxu0 %v2714_v33  ;;  %v2846_v59 = vld [vmem:[%s5220_s8 + $0x6b0] sm:$0xff]  ;;  %v2781_v33 = vld [vmem:[%s5220_s8 + $0x4a8] sm:$0xff] }
 0x4e3   :  { %2053 = vmatprep.subr.mxu1 %v1253_v61  ;;  %2126 = vmatprep.subr.mxu0 %v2713_v62  ;;  %v2845_v61 = vld [vmem:[%s5220_s8 + $0x6a8] sm:$0xff]  ;;  %v2780_v62 = vld [vmem:[%s5220_s8 + $0x4a0] sm:$0xff] }
 0x4e4   :  { %2054 = vmatpush1.msra.mxu1 %v1252_v63  ;;  %2127 = vmatpush1.msra.mxu0 %v2712_v0  ;;  %v2844_v63 = vld [vmem:[%s5220_s8 + $0x6a0] sm:$0xff]  ;;  %v2779_v0 = vld [vmem:[%s5220_s8 + $0x498] sm:$0xff] }
 0x4e5   :  { %2055 = vmatprep.subr.mxu1 %v1251_v1  ;;  %2128 = vmatprep.subr.mxu0 %v2711_v3  ;;  %v2843_v1 = vld [vmem:[%s5220_s8 + $0x698] sm:$0xff]  ;;  %v2778_v3 = vld [vmem:[%s5220_s8 + $0x490] sm:$0xff] }
 0x4e6   :  { %2056 = vmatpush1.msra.mxu1 %v1250_v6  ;;  %2129 = vmatpush1.msra.mxu0 %v2710_v7  ;;  %v2842_v6 = vld [vmem:[%s5220_s8 + $0x690] sm:$0xff]  ;;  %v2777_v7 = vld [vmem:[%s5220_s8 + $0x488] sm:$0xff] }
 0x4e7   :  { %2057 = vmatprep.subr.mxu1 %v1249_v9  ;;  %2130 = vmatprep.subr.mxu0 %v2709_v42  ;;  %v2841_v9 = vld [vmem:[%s5220_s8 + $0x688] sm:$0xff]  ;;  %v2776_v42 = vld [vmem:[%s5220_s8 + $0x480] sm:$0xff] }
 0x4e8   :  { %2058 = vmatpush1.msra.mxu1 %v1248_v10  ;;  %2131 = vmatpush1.msra.mxu0 %v2708_v11  ;;  %v2840_v10 = vld [vmem:[%s5220_s8 + $0x680] sm:$0xff]  ;;  %v2775_v11 = vld [vmem:[%s5220_s8 + $0x478] sm:$0xff] }
 0x4e9   :  { %2059 = vmatprep.subr.mxu1 %v1247_v12  ;;  %2132 = vmatprep.subr.mxu0 %v2707_v13  ;;  %v2839_v12 = vld [vmem:[%s5220_s8 + $0x678] sm:$0xff]  ;;  %v2774_v13 = vld [vmem:[%s5220_s8 + $0x470] sm:$0xff] }
 0x4ea   :  { %2060 = vmatpush1.msra.mxu1 %v1246_v14  ;;  %2133 = vmatpush1.msra.mxu0 %v2706_v15  ;;  %v2838_v14 = vld [vmem:[%s5220_s8 + $0x670] sm:$0xff]  ;;  %v2773_v15 = vld [vmem:[%s5220_s8 + $0x468] sm:$0xff] }
 0x4eb   :  { %2061 = vmatprep.subr.mxu1 %v1245_v16  ;;  %2134 = vmatprep.subr.mxu0 %v2705_v17  ;;  %v2837_v16 = vld [vmem:[%s5220_s8 + $0x668] sm:$0xff]  ;;  %v2772_v17 = vld [vmem:[%s5220_s8 + $0x460] sm:$0xff] }
 0x4ec   :  { %2062 = vmatpush1.msra.mxu1 %v1244_v18  ;;  %2135 = vmatpush1.msra.mxu0 %v2704_v20  ;;  %v2836_v18 = vld [vmem:[%s5220_s8 + $0x660] sm:$0xff]  ;;  %v2771_v20 = vld [vmem:[%s5220_s8 + $0x458] sm:$0xff] }
 0x4ed   :  { %2063 = vmatprep.subr.mxu1 %v1243_v22  ;;  %2136 = vmatprep.subr.mxu0 %v2703_v24  ;;  %v2835_v22 = vld [vmem:[%s5220_s8 + $0x658] sm:$0xff]  ;;  %v2770_v24 = vld [vmem:[%s5220_s8 + $0x450] sm:$0xff] }
 0x4ee   :  { %2064 = vmatpush1.msra.mxu1 %v1242_v26  ;;  %2137 = vmatpush1.msra.mxu0 %v2702_v30  ;;  %v2834_v26 = vld [vmem:[%s5220_s8 + $0x650] sm:$0xff]  ;;  %v2769_v30 = vld [vmem:[%s5220_s8 + $0x448] sm:$0xff] }
 0x4ef   :  { %2065 = vmatprep.subr.mxu1 %v1241_v32  ;;  %2138 = vmatprep.subr.mxu0 %v2701_v34  ;;  %v2833_v32 = vld [vmem:[%s5220_s8 + $0x648] sm:$0xff]  ;;  %v2768_v34 = vld [vmem:[%s5220_s8 + $0x440] sm:$0xff] }
 0x4f0   :  { %2066 = vmatpush1.msra.mxu1 %v1240_v36  ;;  %2139 = vmatpush1.msra.mxu0 %v2700_v38  ;;  %v2832_v36 = vld [vmem:[%s5220_s8 + $0x640] sm:$0xff]  ;;  %v2767_v38 = vld [vmem:[%s5220_s8 + $0x438] sm:$0xff] }
 0x4f1   :  { %2067 = vmatprep.subr.mxu1 %v1239_v40  ;;  %2140 = vmatprep.subr.mxu0 %v2699_v46  ;;  %v2831_v40 = vld [vmem:[%s5220_s8 + $0x638] sm:$0xff]  ;;  %v2766_v46 = vld [vmem:[%s5220_s8 + $0x430] sm:$0xff] }
 0x4f2   :  { %2068 = vmatpush1.msra.mxu1 %v1238_v47  ;;  %2141 = vmatpush1.msra.mxu0 %v2698_v19  ;;  %v2830_v47 = vld [vmem:[%s5220_s8 + $0x630] sm:$0xff]  ;;  %v2765_v19 = vld [vmem:[%s5220_s8 + $0x428] sm:$0xff] }
 0x4f3   :  { %2069 = vmatprep.subr.mxu1 %v1237_v21  ;;  %2142 = vmatprep.subr.mxu0 %v2697_v23  ;;  %v2829_v21 = vld [vmem:[%s5220_s8 + $0x628] sm:$0xff]  ;;  %v2764_v23 = vld [vmem:[%s5220_s8 + $0x420] sm:$0xff] }
 0x4f4   :  { %2070 = vmatpush1.msra.mxu1 %v1236_v25  ;;  %2103 = vmatprep.mubr.f32.mxu1 %v3171_v54  ;;  %v2828_v25 = vld [vmem:[%s5220_s8 + $0x620] sm:$0xff] }
 0x4f5   :  { %2143 = vmatpush1.msra.mxu0 %v2696_v27  ;;  %2176 = vmatprep.mubr.f32.mxu0 %v3171_v54  ;;  %v2763_v27 = vld [vmem:[%s5220_s8 + $0x418] sm:$0xff] }
 0x4f6   :  { %2104 = vmatmul.mubr.f32.vlgmr.msra.gmra.mxu1 %v4216_v45  ;;  %2177 = vmatmul.mubr.f32.vlgmr.msra.gmra.mxu0 %v2110_v48  ;;  %v2787_v45 = vld [vmem:[%s5220_s8 + $0x4d8] sm:$0xff] }
 0x4f7   :  { %2183 = vmatprep.subr.mxu1 %v2791_v29  ;;  %2256 = vmatprep.subr.mxu0 %v2855_v49  ;;  %v2827_v48 = vld [vmem:[%s5220_s8 + $0x618] sm:$0xff]  ;;  %v2762_v29 = vld [vmem:[%s5220_s8 + $0x410] sm:$0xff] }
 0x4f8   :  { %2184 = vmatpush1.msra.mxu1 %v2790_v31  ;;  %2257 = vmatpush1.msra.mxu0 %v2854_v60  ;;  %v2826_v49 = vld [vmem:[%s5220_s8 + $0x610] sm:$0xff]  ;;  %v2761_v31 = vld [vmem:[%s5220_s8 + $0x408] sm:$0xff] }
 0x4f9   :  { %2185 = vmatprep.subr.mxu1 %v2789_v35  ;;  %2258 = vmatprep.subr.mxu0 %v2853_v37  ;;  %v2825_v60 = vld [vmem:[%s5220_s8 + $0x608] sm:$0xff]  ;;  %v2760_v35 = vld [vmem:[%s5220_s8 + $0x400] sm:$0xff] }
 0x4fa   :  { %2186 = vmatpush1.msra.mxu1 %v2788_v57  ;;  %2259 = vmatpush1.msra.mxu0 %v2852_v55  ;;  %v2824_v37 = vld [vmem:[%s5220_s8 + $0x600] sm:$0xff]  ;;  %v2254_v57 = vrot.slane %v4396_v4, 4  ;;  %v2919_v55 = vld [vmem:[%s5220_s8 + $0x8f8] sm:$0xff] }
 0x4fb   :  { %2187 = vmatprep.subr.mxu1 %v2787_v45  ;;  %2260 = vmatprep.subr.mxu0 %v2851_v39  ;;  %v2918_v45 = vld [vmem:[%s5220_s8 + $0x8f0] sm:$0xff]  ;;  %v2917_v39 = vld [vmem:[%s5220_s8 + $0x8e8] sm:$0xff] }
 0x4fc   :  { %2188 = vmatpush1.msra.mxu1 %v2786_v56  ;;  %2261 = vmatpush1.msra.mxu0 %v2850_v41  ;;  %v2916_v56 = vld [vmem:[%s5220_s8 + $0x8e0] sm:$0xff]  ;;  %v2915_v41 = vld [vmem:[%s5220_s8 + $0x8d8] sm:$0xff] }
 0x4fd   :  { %2189 = vmatprep.subr.mxu1 %v2785_v53  ;;  %2262 = vmatprep.subr.mxu0 %v2849_v58  ;;  %v2913_v53 = vld [vmem:[%s5220_s8 + $0x8c8] sm:$0xff]  ;;  %v2911_v58 = vld [vmem:[%s5220_s8 + $0x8b8] sm:$0xff] }
 0x4fe   :  { %2190 = vmatpush1.msra.mxu1 %v2784_v43  ;;  %2263 = vmatpush1.msra.mxu0 %v2848_v44  ;;  %v2910_v43 = vld [vmem:[%s5220_s8 + $0x8b0] sm:$0xff]  ;;  %v2909_v44 = vld [vmem:[%s5220_s8 + $0x8a8] sm:$0xff] }
 0x4ff   :  { %2191 = vmatprep.subr.mxu1 %v2783_v50  ;;  %2264 = vmatprep.subr.mxu0 %v2847_v51  ;;  %v2908_v50 = vld [vmem:[%s5220_s8 + $0x8a0] sm:$0xff]  ;;  %v2907_v51 = vld [vmem:[%s5220_s8 + $0x898] sm:$0xff] }
 0x500   :  { %2192 = vmatpush1.msra.mxu1 %v2782_v52  ;;  %2265 = vmatpush1.msra.mxu0 %v2846_v59  ;;  %v2906_v52 = vld [vmem:[%s5220_s8 + $0x890] sm:$0xff]  ;;  %v2905_v59 = vld [vmem:[%s5220_s8 + $0x888] sm:$0xff] }
 0x501   :  { %2193 = vmatprep.subr.mxu1 %v2781_v33  ;;  %2266 = vmatprep.subr.mxu0 %v2845_v61  ;;  %v2904_v33 = vld [vmem:[%s5220_s8 + $0x880] sm:$0xff]  ;;  %v2903_v61 = vld [vmem:[%s5220_s8 + $0x878] sm:$0xff] }
 0x502   :  { %2194 = vmatpush1.msra.mxu1 %v2780_v62  ;;  %2267 = vmatpush1.msra.mxu0 %v2844_v63  ;;  %v2902_v62 = vld [vmem:[%s5220_s8 + $0x870] sm:$0xff]  ;;  %v2901_v63 = vld [vmem:[%s5220_s8 + $0x868] sm:$0xff] }
 0x503   :  { %2195 = vmatprep.subr.mxu1 %v2779_v0  ;;  %2268 = vmatprep.subr.mxu0 %v2843_v1  ;;  %v2900_v0 = vld [vmem:[%s5220_s8 + $0x860] sm:$0xff]  ;;  %v2899_v1 = vld [vmem:[%s5220_s8 + $0x858] sm:$0xff] }
 0x504   :  { %2196 = vmatpush1.msra.mxu1 %v2778_v3  ;;  %2269 = vmatpush1.msra.mxu0 %v2842_v6  ;;  %v2898_v3 = vld [vmem:[%s5220_s8 + $0x850] sm:$0xff]  ;;  %v2897_v6 = vld [vmem:[%s5220_s8 + $0x848] sm:$0xff] }
 0x505   :  { %2197 = vmatprep.subr.mxu1 %v2777_v7  ;;  %2270 = vmatprep.subr.mxu0 %v2841_v9  ;;  %v2896_v7 = vld [vmem:[%s5220_s8 + $0x840] sm:$0xff]  ;;  %v2895_v9 = vld [vmem:[%s5220_s8 + $0x838] sm:$0xff] }
 0x506   :  { %2198 = vmatpush1.msra.mxu1 %v2776_v42  ;;  %2271 = vmatpush1.msra.mxu0 %v2840_v10  ;;  %v2894_v42 = vld [vmem:[%s5220_s8 + $0x830] sm:$0xff]  ;;  %v2893_v10 = vld [vmem:[%s5220_s8 + $0x828] sm:$0xff] }
 0x507   :  { %2199 = vmatprep.subr.mxu1 %v2775_v11  ;;  %2272 = vmatprep.subr.mxu0 %v2839_v12  ;;  %v2892_v11 = vld [vmem:[%s5220_s8 + $0x820] sm:$0xff]  ;;  %v2891_v12 = vld [vmem:[%s5220_s8 + $0x818] sm:$0xff] }
 0x508   :  { %2200 = vmatpush1.msra.mxu1 %v2774_v13  ;;  %2273 = vmatpush1.msra.mxu0 %v2838_v14  ;;  %v2890_v13 = vld [vmem:[%s5220_s8 + $0x810] sm:$0xff]  ;;  %v2889_v14 = vld [vmem:[%s5220_s8 + $0x808] sm:$0xff] }
 0x509   :  { %2201 = vmatprep.subr.mxu1 %v2773_v15  ;;  %2274 = vmatprep.subr.mxu0 %v2837_v16  ;;  %v2888_v15 = vld [vmem:[%s5220_s8 + $0x800] sm:$0xff]  ;;  %v2453_v16 = vld [vmem:[%s5222_s10 + $0xf8] sm:$0xff] }
 0x50a   :  { %2202 = vmatpush1.msra.mxu1 %v2772_v17  ;;  %2275 = vmatpush1.msra.mxu0 %v2836_v18  ;;  %v2437_v17 = vld [vmem:[%s5222_s10 + $0x78] sm:$0xff]  ;;  %v2452_v18 = vld [vmem:[%s5222_s10 + $0xf0] sm:$0xff] }
 0x50b   :  { %2203 = vmatprep.subr.mxu1 %v2771_v20  ;;  %2276 = vmatprep.subr.mxu0 %v2835_v22  ;;  %v2436_v20 = vld [vmem:[%s5222_s10 + $0x70] sm:$0xff]  ;;  %v2435_v22 = vld [vmem:[%s5222_s10 + $0x68] sm:$0xff] }
 0x50c   :  { %2204 = vmatpush1.msra.mxu1 %v2770_v24  ;;  %2277 = vmatpush1.msra.mxu0 %v2834_v26  ;;  %v2450_v24 = vld [vmem:[%s5222_s10 + $0xe0] sm:$0xff] }
 0x50d   :  { %2205 = vmatprep.subr.mxu1 %v2769_v30  ;;  %2278 = vmatprep.subr.mxu0 %v2833_v32  ;;  %v2434_v26 = vld [vmem:[%s5222_s10 + $0x60] sm:$0xff]  ;;  %v2449_v30 = vld [vmem:[%s5222_s10 + $0xd8] sm:$0xff] }
 0x50e   :  { %2206 = vmatpush1.msra.mxu1 %v2768_v34  ;;  %2279 = vmatpush1.msra.mxu0 %v2832_v36  ;;  %v2433_v32 = vld [vmem:[%s5222_s10 + $0x58] sm:$0xff]  ;;  %v2448_v34 = vld [vmem:[%s5222_s10 + $0xd0] sm:$0xff] }
 0x50f   :  { %2207 = vmatprep.subr.mxu1 %v2767_v38  ;;  %2280 = vmatprep.subr.mxu0 %v2831_v40  ;;  %v2432_v36 = vld [vmem:[%s5222_s10 + $0x50] sm:$0xff]  ;;  %v2447_v38 = vld [vmem:[%s5222_s10 + $0xc8] sm:$0xff] }
 0x510   :  { %2208 = vmatpush1.msra.mxu1 %v2766_v46  ;;  %2281 = vmatpush1.msra.mxu0 %v2830_v47  ;;  %v2431_v40 = vld [vmem:[%s5222_s10 + $0x48] sm:$0xff]  ;;  %v2446_v46 = vld [vmem:[%s5222_s10 + $0xc0] sm:$0xff] }
 0x511   :  { %2209 = vmatprep.subr.mxu1 %v2765_v19  ;;  %2282 = vmatprep.subr.mxu0 %v2829_v21  ;;  %v2430_v47 = vld [vmem:[%s5222_s10 + $0x40] sm:$0xff]  ;;  %v2445_v19 = vld [vmem:[%s5222_s10 + $0xb8] sm:$0xff] }
 0x512   :  { %2210 = vmatpush1.msra.mxu1 %v2764_v23  ;;  %2283 = vmatpush1.msra.mxu0 %v2828_v25  ;;  %v2429_v21 = vld [vmem:[%s5222_s10 + $0x38] sm:$0xff]  ;;  %v2444_v23 = vld [vmem:[%s5222_s10 + $0xb0] sm:$0xff] }
 0x513   :  { %2211 = vmatprep.subr.mxu1 %v2763_v27  ;;  %2284 = vmatprep.subr.mxu0 %v2827_v48  ;;  %v2428_v25 = vld [vmem:[%s5222_s10 + $0x30] sm:$0xff]  ;;  %v2443_v27 = vld [vmem:[%s5222_s10 + $0xa8] sm:$0xff] }
 0x514   :  { %2212 = vmatpush1.msra.mxu1 %v2762_v29  ;;  %2285 = vmatpush1.msra.mxu0 %v2826_v49  ;;  %v2427_v48 = vld [vmem:[%s5222_s10 + $0x28] sm:$0xff]  ;;  %v2442_v29 = vld [vmem:[%s5222_s10 + $0xa0] sm:$0xff] }
 0x515   :  { %2213 = vmatprep.subr.mxu1 %v2761_v31  ;;  %2286 = vmatprep.subr.mxu0 %v2825_v60  ;;  %v2426_v49 = vld [vmem:[%s5222_s10 + $0x20] sm:$0xff]  ;;  %v2441_v31 = vld [vmem:[%s5222_s10 + $0x98] sm:$0xff] }
 0x516   :  { %2214 = vmatpush1.msra.mxu1 %v2760_v35  ;;  %2247 = vmatprep.mubr.f32.mxu1 %v3171_v54  ;;  %v2425_v60 = vld [vmem:[%s5222_s10 + $0x18] sm:$0xff]  ;;  %v2440_v35 = vld [vmem:[%s5222_s10 + $0x90] sm:$0xff] }
 0x517   :  { %2287 = vmatpush1.msra.mxu0 %v2824_v37  ;;  %2320 = vmatprep.mubr.f32.mxu0 %v3171_v54  ;;  %v2424_v37 = vld [vmem:[%s5222_s10 + $0x10] sm:$0xff] }
 0x518   :  { %2248 = vmatmul.mubr.f32.vlgmr.msra.gmra.mxu1 %v4396_v4  ;;  %2321 = vmatmul.mubr.f32.vlgmr.msra.gmra.mxu0 %v2254_v57  ;;  %v2914_v4 = vld [vmem:[%s5220_s8 + $0x8d0] sm:$0xff]  ;;  %v2439_v57 = vld [vmem:[%s5222_s10 + $0x88] sm:$0xff] }
 0x519   :  { %2327 = vmatprep.subr.mxu1 %v2919_v55  ;;  %2391 = vmatprep.mubr.f32.mxu1 %v3171_v54  ;;  %v2912_v54 = vld [vmem:[%s5220_s8 + $0x8c0] sm:$0xff]  ;;  %v2423_v55 = vld [vmem:[%s5222_s10 + $0x8] sm:$0xff] }
 0x51a   :  { %2328 = vmatpush1.msra.mxu1 %v2918_v45  ;;  %3108 = vmatprep.subr.mxu0 %v2453_v16  ;;  %v2438_v45 = vld [vmem:[%s5222_s10 + $0x80] sm:$0xff] }
 0x51b   :  { %2329 = vmatprep.subr.mxu1 %v2917_v39  ;;  %3109 = vmatpush3.msra.mxu0 %v2437_v17  ;;  %v2422_v39 = vld [vmem:[%s5222_s10] sm:$0xff] }
 0x51c   :  { %2330 = vmatpush1.msra.mxu1 %v2916_v56  ;;  %3110 = vmatprep.subr.mxu0 %v2452_v18 }
 0x51d   :  { %2331 = vmatprep.subr.mxu1 %v2915_v41  ;;  %3111 = vmatpush3.msra.mxu0 %v2436_v20 }
 0x51e   :  { %2332 = vmatpush1.msra.mxu1 %v2914_v4 }
 0x51f   :  { %2333 = vmatprep.subr.mxu1 %v2913_v53 }
 0x520   :  { %2334 = vmatpush1.msra.mxu1 %v2912_v54 }
 0x521   :  { %2335 = vmatprep.subr.mxu1 %v2911_v58 }
 0x522   :  { %2336 = vmatpush1.msra.mxu1 %v2910_v43 }
 0x523   :  { %2337 = vmatprep.subr.mxu1 %v2909_v44 }
 0x524   :  { %2338 = vmatpush1.msra.mxu1 %v2908_v50 }
 0x525   :  { %2339 = vmatprep.subr.mxu1 %v2907_v51 }
 0x526   :  { %2340 = vmatpush1.msra.mxu1 %v2906_v52 }
 0x527   :  { %2341 = vmatprep.subr.mxu1 %v2905_v59 }
 0x528   :  { %2342 = vmatpush1.msra.mxu1 %v2904_v33 }
 0x529   :  { %2343 = vmatprep.subr.mxu1 %v2903_v61 }
 0x52a   :  { %2344 = vmatpush1.msra.mxu1 %v2902_v62 }
 0x52b   :  { %2345 = vmatprep.subr.mxu1 %v2901_v63 }
 0x52c   :  { %2346 = vmatpush1.msra.mxu1 %v2900_v0 }
 0x52d   :  { %2347 = vmatprep.subr.mxu1 %v2899_v1 }
 0x52e   :  { %2348 = vmatpush1.msra.mxu1 %v2898_v3 }
 0x52f   :  { %2349 = vmatprep.subr.mxu1 %v2897_v6 }
 0x530   :  { %2350 = vmatpush1.msra.mxu1 %v2896_v7 }
 0x531   :  { %2351 = vmatprep.subr.mxu1 %v2895_v9 }
 0x532   :  { %2352 = vmatpush1.msra.mxu1 %v2894_v42 }
 0x533   :  { %2353 = vmatprep.subr.mxu1 %v2893_v10 }
 0x534   :  { %2354 = vmatpush1.msra.mxu1 %v2892_v11 }
 0x535   :  { %2355 = vmatprep.subr.mxu1 %v2891_v12 }
 0x536   :  { %2356 = vmatpush1.msra.mxu1 %v2890_v13 }
 0x537   :  { %2357 = vmatprep.subr.mxu1 %v2889_v14 }
 0x538   :  { %2358 = vmatpush1.msra.mxu1 %v2888_v15 }
 0x539   :  { %2392 = vmatmul.mubr.f32.vlgmr.msra.gmra.mxu1 %v4595_v28  ;;  %v2451_v28 = vld [vmem:[%s5222_s10 + $0xe8] sm:$0xff] }
 0x53a   :  { %3112 = vmatprep.subr.mxu0 %v2451_v28 }
 0x53b   :  { %3113 = vmatpush3.msra.mxu0 %v2435_v22 }
 0x53c   :  { %3114 = vmatprep.subr.mxu0 %v2450_v24 }
 0x53d   :  { %3115 = vmatpush3.msra.mxu0 %v2434_v26  ;;  %v2408_v26 = vld [vmem:[%s5221_s9] sm:$0x3] }
 0x53e   :  { %3116 = vmatprep.subr.mxu0 %v2449_v30 }
 0x53f   :  { %3117 = vmatpush3.msra.mxu0 %v2433_v32 }
 0x540   :  { %3118 = vmatprep.subr.mxu0 %v2448_v34 }
 0x541   :  { %3119 = vmatpush3.msra.mxu0 %v2432_v36 }
 0x542   :  { %3120 = vmatprep.subr.mxu0 %v2447_v38  ;;  %v2417_v38 = vrot.slane %v2408_v26, %v104_v8 }
 0x543   :  { %3121 = vmatpush3.msra.mxu0 %v2431_v40 }
 0x544   :  { %3122 = vmatprep.subr.mxu0 %v2446_v46  ;;  %v2413_v46 = vrot.slane %v2408_v26, %v100_v5 }
 0x545   :  { %3123 = vmatpush3.msra.mxu0 %v2430_v47 }
 0x546   :  { %3124 = vmatprep.subr.mxu0 %v2445_v19 }
 0x547   :  { %3125 = vmatpush3.msra.mxu0 %v2429_v21 }
 0x548   :  { %3126 = vmatprep.subr.mxu0 %v2444_v23 }
 0x549   :  { %3127 = vmatpush3.msra.mxu0 %v2428_v25 }
 0x54a   :  { %3128 = vmatprep.subr.mxu0 %v2443_v27  ;;  %v2984_v27 = vld [vmem:[%s5223_s11] ss:$0 sm:$0xff]  ;;  %s3149_s11 = scalar_lea.vmem %s2551_s21, 32 }
 0x54b   :  { %3129 = vmatpush3.msra.mxu0 %v2427_v48  ;;  %p3150_p0 = scmp.ne.s32.totalorder %s2551_s21, %s3149_s11  ;;  %p3155_p2 = scmp.lt.s32.totalorder %s3149_s11, %s3149_s11 }
 0x54c   :  { %3130 = vmatprep.subr.mxu0 %v2442_v29 }
 0x54d   :  { %3131 = vmatpush3.msra.mxu0 %v2426_v49  ;;  %p3156_p3 = por %p3155_p2, %p3154_p1 }
 0x54e   :  { %3132 = vmatprep.subr.mxu0 %v2441_v31 }
 0x54f   :  { %3133 = vmatpush3.msra.mxu0 %v2425_v60  ;;  %p3157_p4 = pnand %p3156_p3, %p3150_p0 }
 0x550   :  { %3134 = vmatprep.subr.mxu0 %v2440_v35 }
 0x551   :  { %3135 = vmatpush3.msra.mxu0 %v2424_v37  ;;  %v1370_v56 = vpop.f32.mrf.mxu1  ;;  %v1509_v41 = vpop.f32.mrf.mxu0 }
 0x552   :  { %3136 = vmatprep.subr.mxu0 %v2439_v57 }
 0x553   :  { %3137 = vmatpush3.msra.mxu0 %v2423_v55  ;;  %v1372_v4 = vpop.f32.mrf.mxu1  ;;  %v1511_v53 = vpop.f32.mrf.mxu0 }
 0x554   :  { %3138 = vmatprep.subr.mxu0 %v2438_v45 }
 0x555   :  { %3139 = vmatpush3.msra.mxu0 %v2422_v39 }
 0x572   :  { %v1649_v54 = vpop.f32.mrf.mxu1  ;;  %v1788_v58 = vpop.f32.mrf.mxu0 }
 0x574   :  { %v1651_v43 = vpop.f32.mrf.mxu1  ;;  %v1790_v44 = vpop.f32.mrf.mxu0 }
 0x594   :  { %v1928_v50 = vpop.f32.mrf.mxu1  ;;  %v2034_v51 = vpop.f32.mrf.mxu0 }
 0x596   :  { %v1930_v52 = vpop.f32.mrf.mxu1  ;;  %v2036_v59 = vpop.f32.mrf.mxu0 }
 0x5b6   :  { %v2105_v33 = vpop.f32.mrf.mxu1  ;;  %v2178_v61 = vpop.f32.mrf.mxu0 }
 0x5b7   :  { %v2106_v11 = vadd.f32 %v2105_v33, %v1370_v56  ;;  %v2179_v12 = vadd.f32 %v2178_v61, %v1509_v41 }
 0x5b8   :  { %v2107_v62 = vpop.f32.mrf.mxu1  ;;  %v2180_v63 = vpop.f32.mrf.mxu0 }
 0x5b9   :  { %v2108_v13 = vadd.f32 %v2107_v62, %v1372_v4  ;;  %v2181_v14 = vadd.f32 %v2180_v63, %v1511_v53  ;;  %v2398_v20 = vadd.f32 %v2179_v12, %v2106_v11 }
 0x5bb   :  { %v2399_v22 = vadd.f32 %v2181_v14, %v2108_v13 }
 0x5d8   :  { %v2249_v0 = vpop.f32.mrf.mxu1  ;;  %v2322_v1 = vpop.f32.mrf.mxu0 }
 0x5d9   :  { %v2250_v7 = vadd.f32 %v2249_v0, %v1649_v54  ;;  %v2323_v9 = vadd.f32 %v2322_v1, %v1788_v58 }
 0x5da   :  { %v2251_v3 = vpop.f32.mrf.mxu1  ;;  %v2324_v6 = vpop.f32.mrf.mxu0 }
 0x5db   :  { %v2252_v42 = vadd.f32 %v2251_v3, %v1651_v43  ;;  %v2325_v10 = vadd.f32 %v2324_v6, %v1790_v44  ;;  %v2400_v15 = vadd.f32 %v2323_v9, %v2250_v7 }
 0x5dd   :  { %v2401_v17 = vadd.f32 %v2325_v10, %v2252_v42  ;;  %v2404_v32 = vadd.f32 %v2400_v15, %v2398_v20 }
 0x5df   :  { %v2405_v34 = vadd.f32 %v2401_v17, %v2399_v22 }
 0x5f9   :  { %v2393_v16 = vpop.f32.mrf.mxu1 }
 0x5fa   :  { %v2394_v18 = vadd.f32 %v2393_v16, %v1928_v50 }
 0x5fb   :  { %v2395_v28 = vpop.f32.mrf.mxu1 }
 0x5fc   :  { %v2402_v24 = vadd.f32 %v2394_v18, %v2034_v51  ;;  %v2396_v30 = vadd.f32 %v2395_v28, %v1930_v52 }
 0x5fe   :  { %v2403_v36 = vadd.f32 %v2396_v30, %v2036_v59  ;;  %v2406_v40 = vadd.f32 %v2404_v32, %v2402_v24 }
 0x600   :  { %v2407_v47 = vadd.f32 %v2405_v34, %v2403_v36  ;;  %v2420_v21 = vadd.f32 %v2413_v46, %v2406_v40 }
 0x602   :  { %v2421_v19 = vadd.f32 %v2417_v38, %v2407_v47 }
 0x604   :  { %2525 = vmatprep.mubr.f32.mxu0 %v2421_v19 }
 0x605   :  { %2526 = vmatmul.mubr.f32.vlgmr.msra.gmra.mxu0 %v2420_v21 }
 0x6c5   :  { %v3140_v23 = vpop.f32.mrf.mxu0 }
 0x6c7   :  { %v3141_v25 = vpop.f32.mrf.mxu0 }
 0x6c8   :  { %v3142_v48 = vadd.f32 %v3141_v25, %v3140_v23 }
 0x6ca   :  { %v2528_v29 = vadd.f32 %v3142_v48, %v2984_v27 }
 0x6cc   :  { %v2532_v49 = vsel %vm2531_vm3, %v2528_v29, -inf }
 0x6cd   :  { %2533 = vmax.xlane.f32.xlu0 %v2532_v49 }
 0x756   :  { %v2534_v8 = vpop.xlane.xlu0 %2533 }
 0x757   :  { %v2535_v31 = vsub.f32 %v2528_v29, %v2534_v8 }
 0x759   :  { %v2536_v2 = vmul.f32 1.442695, %v2535_v31 }
 0x75b   :  { %3145 = vpow2.f32 %v2536_v2 }
 0x768   :  { %v3146_v5 = vpop.eup %3145 }
 0x769   :  { %v2538_v60 = vsel %vm2531_vm3, %v3146_v5, 0.0 }
 0x76a   :  { %2539 = vadd.xlane.f32.xlu0 %v2538_v60 }
 0x7f3   :  { %v2540_v35 = vpop.xlane.xlu0 %2539 }
 0x7f4   :  { %3147 = vrcp.f32 %v2540_v35 }
 0x801   :  { %v3148_v37 = vpop.eup %3147 }
 0x802   :  { %v2542_v57 = vmul.f32 %v3148_v37, %v3146_v5 }
 0x804   :  { %2543 = vst [vmem:[#allocation2] sm:$0x3] %v2542_v57 }
 0x805   :  { %3160 = shalt.err (!%p3157_p4)
}
 0x806   :  { %2553 = dma.vmem_to_hbm [thread:$0]  %s2551_s21, 32, %s5224_s12, [#allocation3]  }
 0x807   :  { %3169 = dma.done.wait [#allocation3], 32  }
 0x808   :  { %3170 = vsyncadd [#allocation3], 4294967264 }
 0x809   :  { %2557 = vsyncpa [#allocation3], 1 }

</bundles_post_ra>
